<compile_context>
chip_gen: v6e
topology: v6e:2x2x1
jax: 0.10.0
libtpu: 0.0.40
codegen_flags: <defaults>
</compile_context>

<pallas_src>
import jax
import jax.numpy as jnp
from jax.experimental import pallas as pl
from jax.experimental.pallas import tpu as pltpu


# ----------------------------- fused Pallas kernel ---------------------------


def _make_fused_kernel(*, batch, seq_len, k_size, block_has_ds):
    """One fused kernel for the whole network (one batch shard per grid step).

    Kernel ref layout (positional):
      [0]            x        (1, L*B, Cin)   time-major, batch-folded shard
      per block i:            w1s (K*Cin, Ch), b1 (1, Ch),
                              w2s (K*Ch,  Ch), b2 (1, Ch),
                              [wd (Cin, Ch), bd (1, Ch)]   only if downsample
      dense head:             w1p (L*Clast, H), b1 (1, H), w2t (H, O), b2 (1, O)
      last:          out      (1, B, O)
    """
    lb = seq_len * batch

    def kernel(*refs):
        idx = 0
        x_ref = refs[idx]
        idx += 1
        block_refs = []
        for has_ds in block_has_ds:
            n = 6 if has_ds else 4
            block_refs.append(refs[idx:idx + n])
            idx += n
        w1p_ref, b1d_ref, w2t_ref, b2d_ref = refs[idx:idx + 4]
        idx += 4
        out_ref = refs[idx]

        # Row r = t*batch + b of the batch-folded activations; used to zero the
        # causally-invalid (wrapped) rows of each rolled tap.
        row = jax.lax.broadcasted_iota(jnp.int32, (lb, 1), 0)

        def causal_conv_relu(act, ws_ref, b_ref, dilation):
            """relu(causal dilated conv(act)), act flat (L*B, Cin).

            Tap k needs act shifted down by (K-1-k)*dilation time steps with
            zeros flowing in at the top (causal left pad).  In the row=t*B+b
            layout that is a uniform sublane roll (XLU) + a row mask; the K
            taps are lane-concatenated and contracted with the pre-stacked
            (K*Cin, Ch) weight in ONE MXU matmul (no VMEM pad scratch, no
            serialized tap accumulation chain).
            """
            taps = []
            for k in range(k_size):
                shift = (k_size - 1 - k) * dilation * batch
                if shift == 0:
                    taps.append(act)
                else:
                    rolled = pltpu.roll(act, shift=shift, axis=0)
                    taps.append(jnp.where(row < shift, 0.0, rolled))
            stacked = (jnp.concatenate(taps, axis=1)
                       if k_size > 1 else taps[0])            # (L*B, K*Cin)
            acc = jnp.dot(stacked, ws_ref[...],
                          preferred_element_type=jnp.float32)
            return jnp.maximum(acc + b_ref[...], 0.0)

        cur = x_ref[0]                                        # (L*B, Cin)
        for i, has_ds in enumerate(block_has_ds):
            d = 2 ** i
            if has_ds:
                w1s, b1, w2s, b2, wd, bd = block_refs[i]
            else:
                w1s, b1, w2s, b2 = block_refs[i]
            h = causal_conv_relu(cur, w1s, b1, d)
            h = causal_conv_relu(h, w2s, b2, d)
            if has_ds:
                res = jnp.dot(cur, wd[...],
                              preferred_element_type=jnp.float32) + bd[...]
            else:
                res = cur            # identity residual: no matmul, no bias
            cur = jnp.maximum(h + res, 0.0)                   # (L*B, Ch_i)

        # Dense head.  The channel-major Flatten is absorbed into the
        # pre-permuted (L*C, H) weight; the flatten itself is one lane-concat
        # of per-time row slabs -> one matmul with a >=128-deep contraction.
        flat = jnp.concatenate(
            [cur[t * batch:(t + 1) * batch, :] for t in range(seq_len)],
            axis=1)                                           # (B, L*Clast)
        hid = jnp.maximum(
            jnp.dot(flat, w1p_ref[...], preferred_element_type=jnp.float32)
            + b1d_ref[...], 0.0)
        logits = jnp.dot(hid, w2t_ref[...],
                         preferred_element_type=jnp.float32) + b2d_ref[...]
        out_ref[0] = 1.0 / (1.0 + jnp.exp(-logits))

    return kernel


# --------------------------------- wrappers ----------------------------------


def _full_spec(shape):
    nd = len(shape)
    return pl.BlockSpec(shape, lambda i: (0,) * nd)


def prepare_params(params, *, k_size, seq_len, in_size, out_size):
    """One-time weight re-layout so the per-call kernel sees ready tensors.

    - conv weights (K, Cin, Ch) -> tap-stacked (K*Cin, Ch); biases -> (1, Ch)
    - blocks with equal channels carry NO wd/bd (structural identity residual)
    - dense1 (H, Clast*L) channel-major -> (L*Clast, H)  (absorbs Flatten)
    - dense2 pre-transposed to (H, O)
    """
    flat, block_has_ds, channels = [], [], []
    for blk in params["blocks"]:
        ch = blk["w1"].shape[2]
        channels.append(ch)
        flat += [blk["w1"].reshape(-1, ch), blk["b1"].reshape(1, -1),
                 blk["w2"].reshape(-1, ch), blk["b2"].reshape(1, -1)]
        has_ds = "wd" in blk
        block_has_ds.append(has_ds)
        if has_ds:
            flat += [blk["wd"], blk["bd"].reshape(1, -1)]
    d1w = params["dense1_w"]                                  # (H, Clast*L)
    hdim = d1w.shape[0]
    clast = channels[-1]
    # w1p[t*C + c, h] = d1w[h, c*L + t]  (channel-major flatten absorbed)
    w1p = (d1w.reshape(hdim, clast, seq_len).transpose(2, 1, 0)
           .reshape(seq_len * clast, hdim))
    flat += [w1p, params["dense1_b"].reshape(1, -1),
             params["dense2_w"].T, params["dense2_b"].reshape(1, -1)]
    flat = [jnp.asarray(a, jnp.float32) for a in flat]
    meta = dict(k_size=k_size, seq_len=seq_len, in_size=in_size,
                out_size=out_size, channels=tuple(channels),
                block_has_ds=tuple(block_has_ds))
    return flat, meta


def make_forward(meta, *, batch_shards=1):
    """Builds the jittable forward.  batch_shards>1 adds a 'parallel' grid axis
    over the batch so v7x can use both TensorCores (time stays intra-shard, so
    causal padding needs no halo)."""
    k_size = meta["k_size"]
    seq_len = meta["seq_len"]
    in_size = meta["in_size"]
    out_size = meta["out_size"]
    block_has_ds = meta["block_has_ds"]

    def fwd(x_ncl, prepped):
        B, cin, L = x_ncl.shape
        assert cin == in_size and L == seq_len
        assert B % batch_shards == 0
        b_sh = B // batch_shards
        lb = seq_len * b_sh

        # NCL -> per-shard time-major batch-folded layout (one fused XLA copy):
        # (B, Cin, L) -> (shards, L*b_sh, Cin), row within shard = t*b_sh + b.
        x_f = x_ncl.astype(jnp.float32)
        x_sh = (jnp.transpose(x_f, (2, 0, 1))                 # (L, B, Cin)
                .reshape(seq_len, batch_shards, b_sh, in_size)
                .transpose(1, 0, 2, 3)
                .reshape(batch_shards, lb, in_size))

        kernel = _make_fused_kernel(batch=b_sh, seq_len=seq_len,
                                    k_size=k_size, block_has_ds=block_has_ds)

        in_specs = [pl.BlockSpec((1, lb, in_size), lambda i: (i, 0, 0))]
        in_specs += [_full_spec(a.shape) for a in prepped]
        out_specs = pl.BlockSpec((1, b_sh, out_size), lambda i: (i, 0, 0))

        out = pl.pallas_call(
            kernel,
            out_shape=jax.ShapeDtypeStruct((batch_shards, b_sh, out_size),
                                           jnp.float32),
            grid=(batch_shards,),
            in_specs=in_specs,
            out_specs=out_specs,
            compiler_params=pltpu.CompilerParams(
                dimension_semantics=("parallel",)),
        )(x_sh, *prepped)
        return out.reshape(B, out_size)

    return fwd


# ------------------------------ pure-JAX reference ----------------------------


def ref_forward(x_ncl, params, *, k_size):
    x = jnp.transpose(x_ncl, (0, 2, 1)).astype(jnp.float32)   # (B, L, C)
    L = x.shape[1]
    for i, blk in enumerate(params["blocks"]):
        d = 2 ** i
        pad = (k_size - 1) * d
        xp = jnp.pad(x, ((0, 0), (pad, 0), (0, 0)))
        h1 = sum(jnp.einsum("blc,cd->bld", xp[:, k * d:k * d + L, :],
                            blk["w1"][k]) for k in range(k_size)) + blk["b1"]
        h1 = jnp.maximum(h1, 0.0)
        hp = jnp.pad(h1, ((0, 0), (pad, 0), (0, 0)))
        h2 = sum(jnp.einsum("blc,cd->bld", hp[:, k * d:k * d + L, :],
                            blk["w2"][k]) for k in range(k_size)) + blk["b2"]
        h2 = jnp.maximum(h2, 0.0)
        if "wd" in blk:
            res = jnp.einsum("blc,cd->bld", x, blk["wd"]) + blk["bd"]
        else:
            res = x
        x = jnp.maximum(h2 + res, 0.0)
    flat = jnp.transpose(x, (0, 2, 1)).reshape(x.shape[0], -1)  # channel-major
    h = jnp.maximum(flat @ params["dense1_w"].T + params["dense1_b"], 0.0)
    return jax.nn.sigmoid(h @ params["dense2_w"].T + params["dense2_b"])


# -------------------------------- param setup ---------------------------------


def init_params(key, in_size, out_size, num_channels, k_size, seq_len):
    keys = iter(jax.random.split(key, 64))
    blocks = []
    prev = in_size
    for ch in num_channels:
        blk = dict(
            w1=0.1 * jax.random.normal(next(keys), (k_size, prev, ch),
                                       jnp.float32),
            b1=0.1 * jax.random.normal(next(keys), (ch,), jnp.float32),
            w2=0.1 * jax.random.normal(next(keys), (k_size, ch, ch),
                                       jnp.float32),
            b2=0.1 * jax.random.normal(next(keys), (ch,), jnp.float32),
        )
        if prev != ch:  # PyTorch only adds the 1x1 downsample when sizes differ
            blk["wd"] = 0.1 * jax.random.normal(next(keys), (prev, ch),
                                                jnp.float32)
            blk["bd"] = 0.1 * jax.random.normal(next(keys), (ch,), jnp.float32)
        blocks.append(blk)
        prev = ch
    flat_dim = num_channels[-1] * seq_len
    return dict(
        blocks=blocks,
        dense1_w=0.1 * jax.random.normal(next(keys),
                                         (num_channels[-1], flat_dim),
                                         jnp.float32),
        dense1_b=0.1 * jax.random.normal(next(keys), (num_channels[-1],),
                                         jnp.float32),
        dense2_w=0.1 * jax.random.normal(next(keys),
                                         (out_size, num_channels[-1]),
                                         jnp.float32),
        dense2_b=0.1 * jax.random.normal(next(keys), (out_size,), jnp.float32),
    )


# ----------------------------------- main --------------------------------------


if __name__ == "__main__":
    B, IN_SIZE, SEQ_LEN = 2, 4, 16
    NUM_CHANNELS = [8, 16, 16]   # last block exercises the identity-residual path
    K_SIZE = 3
    OUT_SIZE = 3

    root = jax.random.PRNGKey(0)
    kx, kp = jax.random.split(root)
    x = jax.random.normal(kx, (B, IN_SIZE, SEQ_LEN), jnp.float32)  # NCL layout
    params = init_params(kp, IN_SIZE, OUT_SIZE, NUM_CHANNELS, K_SIZE, SEQ_LEN)

    # One-time weight re-layout (tap-stacked convs, flatten-absorbing dense1).
    prepped, meta = prepare_params(params, k_size=K_SIZE, seq_len=SEQ_LEN,
                                   in_size=IN_SIZE, out_size=OUT_SIZE)

    ref = jax.block_until_ready(ref_forward(x, params, k_size=K_SIZE))

    # Single-TC path (v5e / v6e default).
    fwd = jax.jit(make_forward(meta, batch_shards=1))
    out = jax.block_until_ready(fwd(x, prepped))
    assert out.shape == (B, OUT_SIZE)
    assert jnp.allclose(out, ref, rtol=1e-5, atol=1e-5), (out, ref)

    # Batch-parallel grid (fills both TensorCores on v7x; correct everywhere).
    fwd2 = jax.jit(make_forward(meta, batch_shards=2))
    out2 = jax.block_until_ready(fwd2(x, prepped))
    assert jnp.allclose(out2, ref, rtol=1e-5, atol=1e-5), (out2, ref)

    print("KERNEL_OK")
</pallas_src>

<mosaic_0001>
module attributes {stable_mosaic.version = 11 : i64} {
  func.func @kernel(%arg0: i32, %arg1: memref<1x32x4xf32, #tpu.memory_space<vmem>>, %arg2: memref<12x8xf32, #tpu.memory_space<vmem>>, %arg3: memref<1x8xf32, #tpu.memory_space<vmem>>, %arg4: memref<24x8xf32, #tpu.memory_space<vmem>>, %arg5: memref<1x8xf32, #tpu.memory_space<vmem>>, %arg6: memref<4x8xf32, #tpu.memory_space<vmem>>, %arg7: memref<1x8xf32, #tpu.memory_space<vmem>>, %arg8: memref<24x16xf32, #tpu.memory_space<vmem>>, %arg9: memref<1x16xf32, #tpu.memory_space<vmem>>, %arg10: memref<48x16xf32, #tpu.memory_space<vmem>>, %arg11: memref<1x16xf32, #tpu.memory_space<vmem>>, %arg12: memref<8x16xf32, #tpu.memory_space<vmem>>, %arg13: memref<1x16xf32, #tpu.memory_space<vmem>>, %arg14: memref<48x16xf32, #tpu.memory_space<vmem>>, %arg15: memref<1x16xf32, #tpu.memory_space<vmem>>, %arg16: memref<48x16xf32, #tpu.memory_space<vmem>>, %arg17: memref<1x16xf32, #tpu.memory_space<vmem>>, %arg18: memref<256x16xf32, #tpu.memory_space<vmem>>, %arg19: memref<1x16xf32, #tpu.memory_space<vmem>>, %arg20: memref<16x3xf32, #tpu.memory_space<vmem>>, %arg21: memref<1x3xf32, #tpu.memory_space<vmem>>, %arg22: memref<1x2x3xf32, #tpu.memory_space<vmem>>) attributes {dimension_semantics = [#tpu.dimension_semantics<parallel>], iteration_bounds = array<i64: 1>, scalar_prefetch = 0 : i64, scratch_operands = 0 : i64, tpu.core_type = #tpu.core_type<tc>, window_params = [{transform_indices = @transform_0, window_bounds = array<i64: 1, 32, 4>}, {pipeline_mode = #tpu.pipeline_mode<synchronous>, transform_indices = @transform_1, window_bounds = array<i64: 12, 8>}, {pipeline_mode = #tpu.pipeline_mode<synchronous>, transform_indices = @transform_2, window_bounds = array<i64: 1, 8>}, {pipeline_mode = #tpu.pipeline_mode<synchronous>, transform_indices = @transform_3, window_bounds = array<i64: 24, 8>}, {pipeline_mode = #tpu.pipeline_mode<synchronous>, transform_indices = @transform_4, window_bounds = array<i64: 1, 8>}, {pipeline_mode = #tpu.pipeline_mode<synchronous>, transform_indices = @transform_5, window_bounds = array<i64: 4, 8>}, {pipeline_mode = #tpu.pipeline_mode<synchronous>, transform_indices = @transform_6, window_bounds = array<i64: 1, 8>}, {pipeline_mode = #tpu.pipeline_mode<synchronous>, transform_indices = @transform_7, window_bounds = array<i64: 24, 16>}, {pipeline_mode = #tpu.pipeline_mode<synchronous>, transform_indices = @transform_8, window_bounds = array<i64: 1, 16>}, {pipeline_mode = #tpu.pipeline_mode<synchronous>, transform_indices = @transform_9, window_bounds = array<i64: 48, 16>}, {pipeline_mode = #tpu.pipeline_mode<synchronous>, transform_indices = @transform_10, window_bounds = array<i64: 1, 16>}, {pipeline_mode = #tpu.pipeline_mode<synchronous>, transform_indices = @transform_11, window_bounds = array<i64: 8, 16>}, {pipeline_mode = #tpu.pipeline_mode<synchronous>, transform_indices = @transform_12, window_bounds = array<i64: 1, 16>}, {pipeline_mode = #tpu.pipeline_mode<synchronous>, transform_indices = @transform_13, window_bounds = array<i64: 48, 16>}, {pipeline_mode = #tpu.pipeline_mode<synchronous>, transform_indices = @transform_14, window_bounds = array<i64: 1, 16>}, {pipeline_mode = #tpu.pipeline_mode<synchronous>, transform_indices = @transform_15, window_bounds = array<i64: 48, 16>}, {pipeline_mode = #tpu.pipeline_mode<synchronous>, transform_indices = @transform_16, window_bounds = array<i64: 1, 16>}, {pipeline_mode = #tpu.pipeline_mode<synchronous>, transform_indices = @transform_17, window_bounds = array<i64: 256, 16>}, {pipeline_mode = #tpu.pipeline_mode<synchronous>, transform_indices = @transform_18, window_bounds = array<i64: 1, 16>}, {pipeline_mode = #tpu.pipeline_mode<synchronous>, transform_indices = @transform_19, window_bounds = array<i64: 16, 3>}, {pipeline_mode = #tpu.pipeline_mode<synchronous>, transform_indices = @transform_20, window_bounds = array<i64: 1, 3>}, {transform_indices = @transform_21, window_bounds = array<i64: 1, 2, 3>}]} {
    %0 = tpu.iota {dimensions = array<i32: 0>} : vector<32x1xi32>
    %c0 = arith.constant 0 : index
    %c0_0 = arith.constant 0 : index
    %c0_1 = arith.constant 0 : index
    %1 = vector.load %arg1[%c0, %c0_0, %c0_1] : memref<1x32x4xf32, #tpu.memory_space<vmem>>, vector<1x32x4xf32>
    %2 = vector.shape_cast %1 : vector<1x32x4xf32> to vector<32x4xf32>
    %c4_i32 = arith.constant 4 : i32
    %3 = tpu.dynamic_rotate %2 by %c4_i32 dim 0 : vector<32x4xf32>, i32 -> vector<32x4xf32>
    %c4_i32_2 = arith.constant 4 : i32
    %4 = vector.broadcast %c4_i32_2 : i32 to vector<32x1xi32>
    %5 = arith.cmpi slt, %0, %4 : vector<32x1xi32>
    %cst = arith.constant 0.000000e+00 : f32
    %6 = vector.shape_cast %5 : vector<32x1xi1> to vector<32x1xi1>
    %7 = vector.broadcast %6 : vector<32x1xi1> to vector<32x4xi1>
    %8 = vector.broadcast %cst : f32 to vector<32x4xf32>
    %9 = arith.select %7, %8, %3 : vector<32x4xi1>, vector<32x4xf32>
    %c2_i32 = arith.constant 2 : i32
    %10 = tpu.dynamic_rotate %2 by %c2_i32 dim 0 : vector<32x4xf32>, i32 -> vector<32x4xf32>
    %c2_i32_3 = arith.constant 2 : i32
    %11 = vector.broadcast %c2_i32_3 : i32 to vector<32x1xi32>
    %12 = arith.cmpi slt, %0, %11 : vector<32x1xi32>
    %cst_4 = arith.constant 0.000000e+00 : f32
    %13 = vector.shape_cast %12 : vector<32x1xi1> to vector<32x1xi1>
    %14 = vector.broadcast %13 : vector<32x1xi1> to vector<32x4xi1>
    %15 = vector.broadcast %cst_4 : f32 to vector<32x4xf32>
    %16 = arith.select %14, %15, %10 : vector<32x4xi1>, vector<32x4xf32>
    %17 = tpu.concatenate %9, %16, %2 in 1 : vector<32x4xf32>, vector<32x4xf32>, vector<32x4xf32> -> vector<32x12xf32>
    %c0_5 = arith.constant 0 : index
    %c0_6 = arith.constant 0 : index
    %18 = vector.load %arg2[%c0_5, %c0_6] : memref<12x8xf32, #tpu.memory_space<vmem>>, vector<12x8xf32>
    %cst_7 = arith.constant dense<0.000000e+00> : vector<32x8xf32>
    %19 = tpu.matmul %17, %18, %cst_7 {dimension_numbers = #tpu.dot_dimension_numbers<[1], [0], [0], [1], [0, 0, 1, 1], [], []>} : vector<32x12xf32>, vector<12x8xf32>, vector<32x8xf32> -> vector<32x8xf32>
    %c0_8 = arith.constant 0 : index
    %c0_9 = arith.constant 0 : index
    %20 = vector.load %arg3[%c0_8, %c0_9] : memref<1x8xf32, #tpu.memory_space<vmem>>, vector<1x8xf32>
    %21 = vector.broadcast %20 : vector<1x8xf32> to vector<32x8xf32>
    %22 = arith.addf %19, %21 : vector<32x8xf32>
    %cst_10 = arith.constant 0.000000e+00 : f32
    %23 = vector.broadcast %cst_10 : f32 to vector<32x8xf32>
    %24 = arith.maximumf %22, %23 : vector<32x8xf32>
    %c4_i32_11 = arith.constant 4 : i32
    %25 = tpu.dynamic_rotate %24 by %c4_i32_11 dim 0 : vector<32x8xf32>, i32 -> vector<32x8xf32>
    %c4_i32_12 = arith.constant 4 : i32
    %26 = vector.broadcast %c4_i32_12 : i32 to vector<32x1xi32>
    %27 = arith.cmpi slt, %0, %26 : vector<32x1xi32>
    %cst_13 = arith.constant 0.000000e+00 : f32
    %28 = vector.shape_cast %27 : vector<32x1xi1> to vector<32x1xi1>
    %29 = vector.broadcast %28 : vector<32x1xi1> to vector<32x8xi1>
    %30 = vector.broadcast %cst_13 : f32 to vector<32x8xf32>
    %31 = arith.select %29, %30, %25 : vector<32x8xi1>, vector<32x8xf32>
    %c2_i32_14 = arith.constant 2 : i32
    %32 = tpu.dynamic_rotate %24 by %c2_i32_14 dim 0 : vector<32x8xf32>, i32 -> vector<32x8xf32>
    %c2_i32_15 = arith.constant 2 : i32
    %33 = vector.broadcast %c2_i32_15 : i32 to vector<32x1xi32>
    %34 = arith.cmpi slt, %0, %33 : vector<32x1xi32>
    %cst_16 = arith.constant 0.000000e+00 : f32
    %35 = vector.shape_cast %34 : vector<32x1xi1> to vector<32x1xi1>
    %36 = vector.broadcast %35 : vector<32x1xi1> to vector<32x8xi1>
    %37 = vector.broadcast %cst_16 : f32 to vector<32x8xf32>
    %38 = arith.select %36, %37, %32 : vector<32x8xi1>, vector<32x8xf32>
    %39 = tpu.concatenate %31, %38, %24 in 1 : vector<32x8xf32>, vector<32x8xf32>, vector<32x8xf32> -> vector<32x24xf32>
    %c0_17 = arith.constant 0 : index
    %c0_18 = arith.constant 0 : index
    %40 = vector.load %arg4[%c0_17, %c0_18] : memref<24x8xf32, #tpu.memory_space<vmem>>, vector<24x8xf32>
    %cst_19 = arith.constant dense<0.000000e+00> : vector<32x8xf32>
    %41 = tpu.matmul %39, %40, %cst_19 {dimension_numbers = #tpu.dot_dimension_numbers<[1], [0], [0], [1], [0, 0, 1, 1], [], []>} : vector<32x24xf32>, vector<24x8xf32>, vector<32x8xf32> -> vector<32x8xf32>
    %c0_20 = arith.constant 0 : index
    %c0_21 = arith.constant 0 : index
    %42 = vector.load %arg5[%c0_20, %c0_21] : memref<1x8xf32, #tpu.memory_space<vmem>>, vector<1x8xf32>
    %43 = vector.broadcast %42 : vector<1x8xf32> to vector<32x8xf32>
    %44 = arith.addf %41, %43 : vector<32x8xf32>
    %cst_22 = arith.constant 0.000000e+00 : f32
    %45 = vector.broadcast %cst_22 : f32 to vector<32x8xf32>
    %46 = arith.maximumf %44, %45 : vector<32x8xf32>
    %c0_23 = arith.constant 0 : index
    %c0_24 = arith.constant 0 : index
    %47 = vector.load %arg6[%c0_23, %c0_24] : memref<4x8xf32, #tpu.memory_space<vmem>>, vector<4x8xf32>
    %cst_25 = arith.constant dense<0.000000e+00> : vector<32x8xf32>
    %48 = tpu.matmul %2, %47, %cst_25 {dimension_numbers = #tpu.dot_dimension_numbers<[1], [0], [0], [1], [0, 0, 1, 1], [], []>} : vector<32x4xf32>, vector<4x8xf32>, vector<32x8xf32> -> vector<32x8xf32>
    %c0_26 = arith.constant 0 : index
    %c0_27 = arith.constant 0 : index
    %49 = vector.load %arg7[%c0_26, %c0_27] : memref<1x8xf32, #tpu.memory_space<vmem>>, vector<1x8xf32>
    %50 = vector.broadcast %49 : vector<1x8xf32> to vector<32x8xf32>
    %51 = arith.addf %48, %50 : vector<32x8xf32>
    %52 = arith.addf %46, %51 : vector<32x8xf32>
    %cst_28 = arith.constant 0.000000e+00 : f32
    %53 = vector.broadcast %cst_28 : f32 to vector<32x8xf32>
    %54 = arith.maximumf %52, %53 : vector<32x8xf32>
    %c8_i32 = arith.constant 8 : i32
    %55 = tpu.dynamic_rotate %54 by %c8_i32 dim 0 : vector<32x8xf32>, i32 -> vector<32x8xf32>
    %c8_i32_29 = arith.constant 8 : i32
    %56 = vector.broadcast %c8_i32_29 : i32 to vector<32x1xi32>
    %57 = arith.cmpi slt, %0, %56 : vector<32x1xi32>
    %cst_30 = arith.constant 0.000000e+00 : f32
    %58 = vector.shape_cast %57 : vector<32x1xi1> to vector<32x1xi1>
    %59 = vector.broadcast %58 : vector<32x1xi1> to vector<32x8xi1>
    %60 = vector.broadcast %cst_30 : f32 to vector<32x8xf32>
    %61 = arith.select %59, %60, %55 : vector<32x8xi1>, vector<32x8xf32>
    %c4_i32_31 = arith.constant 4 : i32
    %62 = tpu.dynamic_rotate %54 by %c4_i32_31 dim 0 : vector<32x8xf32>, i32 -> vector<32x8xf32>
    %c4_i32_32 = arith.constant 4 : i32
    %63 = vector.broadcast %c4_i32_32 : i32 to vector<32x1xi32>
    %64 = arith.cmpi slt, %0, %63 : vector<32x1xi32>
    %cst_33 = arith.constant 0.000000e+00 : f32
    %65 = vector.shape_cast %64 : vector<32x1xi1> to vector<32x1xi1>
    %66 = vector.broadcast %65 : vector<32x1xi1> to vector<32x8xi1>
    %67 = vector.broadcast %cst_33 : f32 to vector<32x8xf32>
    %68 = arith.select %66, %67, %62 : vector<32x8xi1>, vector<32x8xf32>
    %69 = tpu.concatenate %61, %68, %54 in 1 : vector<32x8xf32>, vector<32x8xf32>, vector<32x8xf32> -> vector<32x24xf32>
    %c0_34 = arith.constant 0 : index
    %c0_35 = arith.constant 0 : index
    %70 = vector.load %arg8[%c0_34, %c0_35] : memref<24x16xf32, #tpu.memory_space<vmem>>, vector<24x16xf32>
    %cst_36 = arith.constant dense<0.000000e+00> : vector<32x16xf32>
    %71 = tpu.matmul %69, %70, %cst_36 {dimension_numbers = #tpu.dot_dimension_numbers<[1], [0], [0], [1], [0, 0, 1, 1], [], []>} : vector<32x24xf32>, vector<24x16xf32>, vector<32x16xf32> -> vector<32x16xf32>
    %c0_37 = arith.constant 0 : index
    %c0_38 = arith.constant 0 : index
    %72 = vector.load %arg9[%c0_37, %c0_38] : memref<1x16xf32, #tpu.memory_space<vmem>>, vector<1x16xf32>
    %73 = vector.broadcast %72 : vector<1x16xf32> to vector<32x16xf32>
    %74 = arith.addf %71, %73 : vector<32x16xf32>
    %cst_39 = arith.constant 0.000000e+00 : f32
    %75 = vector.broadcast %cst_39 : f32 to vector<32x16xf32>
    %76 = arith.maximumf %74, %75 : vector<32x16xf32>
    %c8_i32_40 = arith.constant 8 : i32
    %77 = tpu.dynamic_rotate %76 by %c8_i32_40 dim 0 : vector<32x16xf32>, i32 -> vector<32x16xf32>
    %c8_i32_41 = arith.constant 8 : i32
    %78 = vector.broadcast %c8_i32_41 : i32 to vector<32x1xi32>
    %79 = arith.cmpi slt, %0, %78 : vector<32x1xi32>
    %cst_42 = arith.constant 0.000000e+00 : f32
    %80 = vector.shape_cast %79 : vector<32x1xi1> to vector<32x1xi1>
    %81 = vector.broadcast %80 : vector<32x1xi1> to vector<32x16xi1>
    %82 = vector.broadcast %cst_42 : f32 to vector<32x16xf32>
    %83 = arith.select %81, %82, %77 : vector<32x16xi1>, vector<32x16xf32>
    %c4_i32_43 = arith.constant 4 : i32
    %84 = tpu.dynamic_rotate %76 by %c4_i32_43 dim 0 : vector<32x16xf32>, i32 -> vector<32x16xf32>
    %c4_i32_44 = arith.constant 4 : i32
    %85 = vector.broadcast %c4_i32_44 : i32 to vector<32x1xi32>
    %86 = arith.cmpi slt, %0, %85 : vector<32x1xi32>
    %cst_45 = arith.constant 0.000000e+00 : f32
    %87 = vector.shape_cast %86 : vector<32x1xi1> to vector<32x1xi1>
    %88 = vector.broadcast %87 : vector<32x1xi1> to vector<32x16xi1>
    %89 = vector.broadcast %cst_45 : f32 to vector<32x16xf32>
    %90 = arith.select %88, %89, %84 : vector<32x16xi1>, vector<32x16xf32>
    %91 = tpu.concatenate %83, %90, %76 in 1 : vector<32x16xf32>, vector<32x16xf32>, vector<32x16xf32> -> vector<32x48xf32>
    %c0_46 = arith.constant 0 : index
    %c0_47 = arith.constant 0 : index
    %92 = vector.load %arg10[%c0_46, %c0_47] : memref<48x16xf32, #tpu.memory_space<vmem>>, vector<48x16xf32>
    %cst_48 = arith.constant dense<0.000000e+00> : vector<32x16xf32>
    %93 = tpu.matmul %91, %92, %cst_48 {dimension_numbers = #tpu.dot_dimension_numbers<[1], [0], [0], [1], [0, 0, 1, 1], [], []>} : vector<32x48xf32>, vector<48x16xf32>, vector<32x16xf32> -> vector<32x16xf32>
    %c0_49 = arith.constant 0 : index
    %c0_50 = arith.constant 0 : index
    %94 = vector.load %arg11[%c0_49, %c0_50] : memref<1x16xf32, #tpu.memory_space<vmem>>, vector<1x16xf32>
    %95 = vector.broadcast %94 : vector<1x16xf32> to vector<32x16xf32>
    %96 = arith.addf %93, %95 : vector<32x16xf32>
    %cst_51 = arith.constant 0.000000e+00 : f32
    %97 = vector.broadcast %cst_51 : f32 to vector<32x16xf32>
    %98 = arith.maximumf %96, %97 : vector<32x16xf32>
    %c0_52 = arith.constant 0 : index
    %c0_53 = arith.constant 0 : index
    %99 = vector.load %arg12[%c0_52, %c0_53] : memref<8x16xf32, #tpu.memory_space<vmem>>, vector<8x16xf32>
    %cst_54 = arith.constant dense<0.000000e+00> : vector<32x16xf32>
    %100 = tpu.matmul %54, %99, %cst_54 {dimension_numbers = #tpu.dot_dimension_numbers<[1], [0], [0], [1], [0, 0, 1, 1], [], []>} : vector<32x8xf32>, vector<8x16xf32>, vector<32x16xf32> -> vector<32x16xf32>
    %c0_55 = arith.constant 0 : index
    %c0_56 = arith.constant 0 : index
    %101 = vector.load %arg13[%c0_55, %c0_56] : memref<1x16xf32, #tpu.memory_space<vmem>>, vector<1x16xf32>
    %102 = vector.broadcast %101 : vector<1x16xf32> to vector<32x16xf32>
    %103 = arith.addf %100, %102 : vector<32x16xf32>
    %104 = arith.addf %98, %103 : vector<32x16xf32>
    %cst_57 = arith.constant 0.000000e+00 : f32
    %105 = vector.broadcast %cst_57 : f32 to vector<32x16xf32>
    %106 = arith.maximumf %104, %105 : vector<32x16xf32>
    %c16_i32 = arith.constant 16 : i32
    %107 = tpu.dynamic_rotate %106 by %c16_i32 dim 0 : vector<32x16xf32>, i32 -> vector<32x16xf32>
    %c16_i32_58 = arith.constant 16 : i32
    %108 = vector.broadcast %c16_i32_58 : i32 to vector<32x1xi32>
    %109 = arith.cmpi slt, %0, %108 : vector<32x1xi32>
    %cst_59 = arith.constant 0.000000e+00 : f32
    %110 = vector.shape_cast %109 : vector<32x1xi1> to vector<32x1xi1>
    %111 = vector.broadcast %110 : vector<32x1xi1> to vector<32x16xi1>
    %112 = vector.broadcast %cst_59 : f32 to vector<32x16xf32>
    %113 = arith.select %111, %112, %107 : vector<32x16xi1>, vector<32x16xf32>
    %c8_i32_60 = arith.constant 8 : i32
    %114 = tpu.dynamic_rotate %106 by %c8_i32_60 dim 0 : vector<32x16xf32>, i32 -> vector<32x16xf32>
    %c8_i32_61 = arith.constant 8 : i32
    %115 = vector.broadcast %c8_i32_61 : i32 to vector<32x1xi32>
    %116 = arith.cmpi slt, %0, %115 : vector<32x1xi32>
    %cst_62 = arith.constant 0.000000e+00 : f32
    %117 = vector.shape_cast %116 : vector<32x1xi1> to vector<32x1xi1>
    %118 = vector.broadcast %117 : vector<32x1xi1> to vector<32x16xi1>
    %119 = vector.broadcast %cst_62 : f32 to vector<32x16xf32>
    %120 = arith.select %118, %119, %114 : vector<32x16xi1>, vector<32x16xf32>
    %121 = tpu.concatenate %113, %120, %106 in 1 : vector<32x16xf32>, vector<32x16xf32>, vector<32x16xf32> -> vector<32x48xf32>
    %c0_63 = arith.constant 0 : index
    %c0_64 = arith.constant 0 : index
    %122 = vector.load %arg14[%c0_63, %c0_64] : memref<48x16xf32, #tpu.memory_space<vmem>>, vector<48x16xf32>
    %cst_65 = arith.constant dense<0.000000e+00> : vector<32x16xf32>
    %123 = tpu.matmul %121, %122, %cst_65 {dimension_numbers = #tpu.dot_dimension_numbers<[1], [0], [0], [1], [0, 0, 1, 1], [], []>} : vector<32x48xf32>, vector<48x16xf32>, vector<32x16xf32> -> vector<32x16xf32>
    %c0_66 = arith.constant 0 : index
    %c0_67 = arith.constant 0 : index
    %124 = vector.load %arg15[%c0_66, %c0_67] : memref<1x16xf32, #tpu.memory_space<vmem>>, vector<1x16xf32>
    %125 = vector.broadcast %124 : vector<1x16xf32> to vector<32x16xf32>
    %126 = arith.addf %123, %125 : vector<32x16xf32>
    %cst_68 = arith.constant 0.000000e+00 : f32
    %127 = vector.broadcast %cst_68 : f32 to vector<32x16xf32>
    %128 = arith.maximumf %126, %127 : vector<32x16xf32>
    %c16_i32_69 = arith.constant 16 : i32
    %129 = tpu.dynamic_rotate %128 by %c16_i32_69 dim 0 : vector<32x16xf32>, i32 -> vector<32x16xf32>
    %c16_i32_70 = arith.constant 16 : i32
    %130 = vector.broadcast %c16_i32_70 : i32 to vector<32x1xi32>
    %131 = arith.cmpi slt, %0, %130 : vector<32x1xi32>
    %cst_71 = arith.constant 0.000000e+00 : f32
    %132 = vector.shape_cast %131 : vector<32x1xi1> to vector<32x1xi1>
    %133 = vector.broadcast %132 : vector<32x1xi1> to vector<32x16xi1>
    %134 = vector.broadcast %cst_71 : f32 to vector<32x16xf32>
    %135 = arith.select %133, %134, %129 : vector<32x16xi1>, vector<32x16xf32>
    %c8_i32_72 = arith.constant 8 : i32
    %136 = tpu.dynamic_rotate %128 by %c8_i32_72 dim 0 : vector<32x16xf32>, i32 -> vector<32x16xf32>
    %c8_i32_73 = arith.constant 8 : i32
    %137 = vector.broadcast %c8_i32_73 : i32 to vector<32x1xi32>
    %138 = arith.cmpi slt, %0, %137 : vector<32x1xi32>
    %cst_74 = arith.constant 0.000000e+00 : f32
    %139 = vector.shape_cast %138 : vector<32x1xi1> to vector<32x1xi1>
    %140 = vector.broadcast %139 : vector<32x1xi1> to vector<32x16xi1>
    %141 = vector.broadcast %cst_74 : f32 to vector<32x16xf32>
    %142 = arith.select %140, %141, %136 : vector<32x16xi1>, vector<32x16xf32>
    %143 = tpu.concatenate %135, %142, %128 in 1 : vector<32x16xf32>, vector<32x16xf32>, vector<32x16xf32> -> vector<32x48xf32>
    %c0_75 = arith.constant 0 : index
    %c0_76 = arith.constant 0 : index
    %144 = vector.load %arg16[%c0_75, %c0_76] : memref<48x16xf32, #tpu.memory_space<vmem>>, vector<48x16xf32>
    %cst_77 = arith.constant dense<0.000000e+00> : vector<32x16xf32>
    %145 = tpu.matmul %143, %144, %cst_77 {dimension_numbers = #tpu.dot_dimension_numbers<[1], [0], [0], [1], [0, 0, 1, 1], [], []>} : vector<32x48xf32>, vector<48x16xf32>, vector<32x16xf32> -> vector<32x16xf32>
    %c0_78 = arith.constant 0 : index
    %c0_79 = arith.constant 0 : index
    %146 = vector.load %arg17[%c0_78, %c0_79] : memref<1x16xf32, #tpu.memory_space<vmem>>, vector<1x16xf32>
    %147 = vector.broadcast %146 : vector<1x16xf32> to vector<32x16xf32>
    %148 = arith.addf %145, %147 : vector<32x16xf32>
    %cst_80 = arith.constant 0.000000e+00 : f32
    %149 = vector.broadcast %cst_80 : f32 to vector<32x16xf32>
    %150 = arith.maximumf %148, %149 : vector<32x16xf32>
    %151 = arith.addf %150, %106 : vector<32x16xf32>
    %cst_81 = arith.constant 0.000000e+00 : f32
    %152 = vector.broadcast %cst_81 : f32 to vector<32x16xf32>
    %153 = arith.maximumf %151, %152 : vector<32x16xf32>
    %154 = vector.extract_strided_slice %153 {offsets = [0, 0], sizes = [2, 16], strides = [1, 1]} : vector<32x16xf32> to vector<2x16xf32>
    %155 = vector.extract_strided_slice %153 {offsets = [2, 0], sizes = [2, 16], strides = [1, 1]} : vector<32x16xf32> to vector<2x16xf32>
    %156 = vector.extract_strided_slice %153 {offsets = [4, 0], sizes = [2, 16], strides = [1, 1]} : vector<32x16xf32> to vector<2x16xf32>
    %157 = vector.extract_strided_slice %153 {offsets = [6, 0], sizes = [2, 16], strides = [1, 1]} : vector<32x16xf32> to vector<2x16xf32>
    %158 = vector.extract_strided_slice %153 {offsets = [8, 0], sizes = [2, 16], strides = [1, 1]} : vector<32x16xf32> to vector<2x16xf32>
    %159 = vector.extract_strided_slice %153 {offsets = [10, 0], sizes = [2, 16], strides = [1, 1]} : vector<32x16xf32> to vector<2x16xf32>
    %160 = vector.extract_strided_slice %153 {offsets = [12, 0], sizes = [2, 16], strides = [1, 1]} : vector<32x16xf32> to vector<2x16xf32>
    %161 = vector.extract_strided_slice %153 {offsets = [14, 0], sizes = [2, 16], strides = [1, 1]} : vector<32x16xf32> to vector<2x16xf32>
    %162 = vector.extract_strided_slice %153 {offsets = [16, 0], sizes = [2, 16], strides = [1, 1]} : vector<32x16xf32> to vector<2x16xf32>
    %163 = vector.extract_strided_slice %153 {offsets = [18, 0], sizes = [2, 16], strides = [1, 1]} : vector<32x16xf32> to vector<2x16xf32>
    %164 = vector.extract_strided_slice %153 {offsets = [20, 0], sizes = [2, 16], strides = [1, 1]} : vector<32x16xf32> to vector<2x16xf32>
    %165 = vector.extract_strided_slice %153 {offsets = [22, 0], sizes = [2, 16], strides = [1, 1]} : vector<32x16xf32> to vector<2x16xf32>
    %166 = vector.extract_strided_slice %153 {offsets = [24, 0], sizes = [2, 16], strides = [1, 1]} : vector<32x16xf32> to vector<2x16xf32>
    %167 = vector.extract_strided_slice %153 {offsets = [26, 0], sizes = [2, 16], strides = [1, 1]} : vector<32x16xf32> to vector<2x16xf32>
    %168 = vector.extract_strided_slice %153 {offsets = [28, 0], sizes = [2, 16], strides = [1, 1]} : vector<32x16xf32> to vector<2x16xf32>
    %169 = vector.extract_strided_slice %153 {offsets = [30, 0], sizes = [2, 16], strides = [1, 1]} : vector<32x16xf32> to vector<2x16xf32>
    %170 = tpu.concatenate %154, %155, %156, %157, %158, %159, %160, %161, %162, %163, %164, %165, %166, %167, %168, %169 in 1 : vector<2x16xf32>, vector<2x16xf32>, vector<2x16xf32>, vector<2x16xf32>, vector<2x16xf32>, vector<2x16xf32>, vector<2x16xf32>, vector<2x16xf32>, vector<2x16xf32>, vector<2x16xf32>, vector<2x16xf32>, vector<2x16xf32>, vector<2x16xf32>, vector<2x16xf32>, vector<2x16xf32>, vector<2x16xf32> -> vector<2x256xf32>
    %c0_82 = arith.constant 0 : index
    %c0_83 = arith.constant 0 : index
    %171 = vector.load %arg18[%c0_82, %c0_83] : memref<256x16xf32, #tpu.memory_space<vmem>>, vector<256x16xf32>
    %cst_84 = arith.constant dense<0.000000e+00> : vector<2x16xf32>
    %172 = tpu.matmul %170, %171, %cst_84 {dimension_numbers = #tpu.dot_dimension_numbers<[1], [0], [0], [1], [0, 0, 1, 1], [], []>} : vector<2x256xf32>, vector<256x16xf32>, vector<2x16xf32> -> vector<2x16xf32>
    %c0_85 = arith.constant 0 : index
    %c0_86 = arith.constant 0 : index
    %173 = vector.load %arg19[%c0_85, %c0_86] : memref<1x16xf32, #tpu.memory_space<vmem>>, vector<1x16xf32>
    %174 = vector.broadcast %173 : vector<1x16xf32> to vector<2x16xf32>
    %175 = arith.addf %172, %174 : vector<2x16xf32>
    %cst_87 = arith.constant 0.000000e+00 : f32
    %176 = vector.broadcast %cst_87 : f32 to vector<2x16xf32>
    %177 = arith.maximumf %175, %176 : vector<2x16xf32>
    %c0_88 = arith.constant 0 : index
    %c0_89 = arith.constant 0 : index
    %178 = vector.load %arg20[%c0_88, %c0_89] : memref<16x3xf32, #tpu.memory_space<vmem>>, vector<16x3xf32>
    %cst_90 = arith.constant dense<0.000000e+00> : vector<2x3xf32>
    %179 = tpu.matmul %177, %178, %cst_90 {dimension_numbers = #tpu.dot_dimension_numbers<[1], [0], [0], [1], [0, 0, 1, 1], [], []>} : vector<2x16xf32>, vector<16x3xf32>, vector<2x3xf32> -> vector<2x3xf32>
    %c0_91 = arith.constant 0 : index
    %c0_92 = arith.constant 0 : index
    %180 = vector.load %arg21[%c0_91, %c0_92] : memref<1x3xf32, #tpu.memory_space<vmem>>, vector<1x3xf32>
    %181 = vector.broadcast %180 : vector<1x3xf32> to vector<2x3xf32>
    %182 = arith.addf %179, %181 : vector<2x3xf32>
    %cst_93 = arith.constant 0.000000e+00 : f32
    %183 = vector.broadcast %cst_93 : f32 to vector<2x3xf32>
    %184 = arith.subf %183, %182 : vector<2x3xf32>
    %185 = math.exp %184 : vector<2x3xf32>
    %cst_94 = arith.constant 1.000000e+00 : f32
    %186 = vector.broadcast %cst_94 : f32 to vector<2x3xf32>
    %187 = arith.addf %186, %185 : vector<2x3xf32>
    %cst_95 = arith.constant 1.000000e+00 : f32
    %188 = vector.broadcast %cst_95 : f32 to vector<2x3xf32>
    %189 = arith.divf %188, %187 : vector<2x3xf32>
    %c0_96 = arith.constant 0 : index
    %c0_97 = arith.constant 0 : index
    %c0_98 = arith.constant 0 : index
    %190 = vector.load %arg22[%c0_96, %c0_97, %c0_98] : memref<1x2x3xf32, #tpu.memory_space<vmem>>, vector<1x2x3xf32>
    %191 = vector.shape_cast %190 : vector<1x2x3xf32> to vector<2x3xf32>
    %192 = vector.shape_cast %189 : vector<2x3xf32> to vector<1x2x3xf32>
    tpu.vector_store %arg22[%c0_96, %c0_97, %c0_98], %192 {strides = array<i32>} : memref<1x2x3xf32, #tpu.memory_space<vmem>>, vector<1x2x3xf32>,
    return
  }
  func.func @transform_0(%arg0: i32) -> (i32, i32, i32) {
    %c0_i32 = arith.constant 0 : i32
    %c0_i32_0 = arith.constant 0 : i32
    %c0_i32_1 = arith.constant 0 : i32
    return %arg0, %c0_i32, %c0_i32_0 : i32, i32, i32
  }
  func.func @transform_1(%arg0: i32) -> (i32, i32) {
    %c0_i32 = arith.constant 0 : i32
    %c0_i32_0 = arith.constant 0 : i32
    %c0_i32_1 = arith.constant 0 : i32
    return %c0_i32, %c0_i32_0 : i32, i32
  }
  func.func @transform_2(%arg0: i32) -> (i32, i32) {
    %c0_i32 = arith.constant 0 : i32
    %c0_i32_0 = arith.constant 0 : i32
    %c0_i32_1 = arith.constant 0 : i32
    return %c0_i32, %c0_i32_0 : i32, i32
  }
  func.func @transform_3(%arg0: i32) -> (i32, i32) {
    %c0_i32 = arith.constant 0 : i32
    %c0_i32_0 = arith.constant 0 : i32
    %c0_i32_1 = arith.constant 0 : i32
    return %c0_i32, %c0_i32_0 : i32, i32
  }
  func.func @transform_4(%arg0: i32) -> (i32, i32) {
    %c0_i32 = arith.constant 0 : i32
    %c0_i32_0 = arith.constant 0 : i32
    %c0_i32_1 = arith.constant 0 : i32
    return %c0_i32, %c0_i32_0 : i32, i32
  }
  func.func @transform_5(%arg0: i32) -> (i32, i32) {
    %c0_i32 = arith.constant 0 : i32
    %c0_i32_0 = arith.constant 0 : i32
    %c0_i32_1 = arith.constant 0 : i32
    return %c0_i32, %c0_i32_0 : i32, i32
  }
  func.func @transform_6(%arg0: i32) -> (i32, i32) {
    %c0_i32 = arith.constant 0 : i32
    %c0_i32_0 = arith.constant 0 : i32
    %c0_i32_1 = arith.constant 0 : i32
    return %c0_i32, %c0_i32_0 : i32, i32
  }
  func.func @transform_7(%arg0: i32) -> (i32, i32) {
    %c0_i32 = arith.constant 0 : i32
    %c0_i32_0 = arith.constant 0 : i32
    %c0_i32_1 = arith.constant 0 : i32
    return %c0_i32, %c0_i32_0 : i32, i32
  }
  func.func @transform_8(%arg0: i32) -> (i32, i32) {
    %c0_i32 = arith.constant 0 : i32
    %c0_i32_0 = arith.constant 0 : i32
    %c0_i32_1 = arith.constant 0 : i32
    return %c0_i32, %c0_i32_0 : i32, i32
  }
  func.func @transform_9(%arg0: i32) -> (i32, i32) {
    %c0_i32 = arith.constant 0 : i32
    %c0_i32_0 = arith.constant 0 : i32
    %c0_i32_1 = arith.constant 0 : i32
    return %c0_i32, %c0_i32_0 : i32, i32
  }
  func.func @transform_10(%arg0: i32) -> (i32, i32) {
    %c0_i32 = arith.constant 0 : i32
    %c0_i32_0 = arith.constant 0 : i32
    %c0_i32_1 = arith.constant 0 : i32
    return %c0_i32, %c0_i32_0 : i32, i32
  }
  func.func @transform_11(%arg0: i32) -> (i32, i32) {
    %c0_i32 = arith.constant 0 : i32
    %c0_i32_0 = arith.constant 0 : i32
    %c0_i32_1 = arith.constant 0 : i32
    return %c0_i32, %c0_i32_0 : i32, i32
  }
  func.func @transform_12(%arg0: i32) -> (i32, i32) {
    %c0_i32 = arith.constant 0 : i32
    %c0_i32_0 = arith.constant 0 : i32
    %c0_i32_1 = arith.constant 0 : i32
    return %c0_i32, %c0_i32_0 : i32, i32
  }
  func.func @transform_13(%arg0: i32) -> (i32, i32) {
    %c0_i32 = arith.constant 0 : i32
    %c0_i32_0 = arith.constant 0 : i32
    %c0_i32_1 = arith.constant 0 : i32
    return %c0_i32, %c0_i32_0 : i32, i32
  }
  func.func @transform_14(%arg0: i32) -> (i32, i32) {
    %c0_i32 = arith.constant 0 : i32
    %c0_i32_0 = arith.constant 0 : i32
    %c0_i32_1 = arith.constant 0 : i32
    return %c0_i32, %c0_i32_0 : i32, i32
  }
  func.func @transform_15(%arg0: i32) -> (i32, i32) {
    %c0_i32 = arith.constant 0 : i32
    %c0_i32_0 = arith.constant 0 : i32
    %c0_i32_1 = arith.constant 0 : i32
    return %c0_i32, %c0_i32_0 : i32, i32
  }
  func.func @transform_16(%arg0: i32) -> (i32, i32) {
    %c0_i32 = arith.constant 0 : i32
    %c0_i32_0 = arith.constant 0 : i32
    %c0_i32_1 = arith.constant 0 : i32
    return %c0_i32, %c0_i32_0 : i32, i32
  }
  func.func @transform_17(%arg0: i32) -> (i32, i32) {
    %c0_i32 = arith.constant 0 : i32
    %c0_i32_0 = arith.constant 0 : i32
    %c0_i32_1 = arith.constant 0 : i32
    return %c0_i32, %c0_i32_0 : i32, i32
  }
  func.func @transform_18(%arg0: i32) -> (i32, i32) {
    %c0_i32 = arith.constant 0 : i32
    %c0_i32_0 = arith.constant 0 : i32
    %c0_i32_1 = arith.constant 0 : i32
    return %c0_i32, %c0_i32_0 : i32, i32
  }
  func.func @transform_19(%arg0: i32) -> (i32, i32) {
    %c0_i32 = arith.constant 0 : i32
    %c0_i32_0 = arith.constant 0 : i32
    %c0_i32_1 = arith.constant 0 : i32
    return %c0_i32, %c0_i32_0 : i32, i32
  }
  func.func @transform_20(%arg0: i32) -> (i32, i32) {
    %c0_i32 = arith.constant 0 : i32
    %c0_i32_0 = arith.constant 0 : i32
    %c0_i32_1 = arith.constant 0 : i32
    return %c0_i32, %c0_i32_0 : i32, i32
  }
  func.func @transform_21(%arg0: i32) -> (i32, i32, i32) {
    %c0_i32 = arith.constant 0 : i32
    %c0_i32_0 = arith.constant 0 : i32
    %c0_i32_1 = arith.constant 0 : i32
    return %arg0, %c0_i32, %c0_i32_0 : i32, i32, i32
  }
}

</mosaic_0001>

<bundles_post_ra>
// kernel: fwd.1
= control target key start
LH: loop header
LB: loop body
LE: loop exit
PB: predicated region body
PF: predicated region fallthrough
CT: control target
= control target key end

     0   :  { %s2608_s0 = inlined_call_operand.vmem [shape: f32[1,32,4], index: 0, kind: input, shape index: {}]   ;;  %s2609_s1 = inlined_call_operand.vmem [shape: f32[12,8], index: 1, kind: input, shape index: {}]   ;;  %s2610_s2 = inlined_call_operand.vmem [shape: f32[1,8], index: 2, kind: input, shape index: {}]   ;;  %s2611_s3 = inlined_call_operand.vmem [shape: f32[24,8], index: 3, kind: input, shape index: {}]   ;;  %s2612_s4 = inlined_call_operand.vmem [shape: f32[1,8], index: 4, kind: input, shape index: {}]   ;;  %s2613_s5 = inlined_call_operand.vmem [shape: f32[4,8], index: 5, kind: input, shape index: {}]   ;;  %s2614_s6 = inlined_call_operand.vmem [shape: f32[1,8], index: 6, kind: input, shape index: {}]   ;;  %s2615_s7 = inlined_call_operand.vmem [shape: f32[24,16], index: 7, kind: input, shape index: {}]   ;;  %s2616_s8 = inlined_call_operand.vmem [shape: f32[1,16], index: 8, kind: input, shape index: {}]   ;;  %s2617_s9 = inlined_call_operand.vmem [shape: f32[48,16], index: 9, kind: input, shape index: {}]   ;;  %s2618_s10 = inlined_call_operand.vmem [shape: f32[1,16], index: 10, kind: input, shape index: {}]   ;;  %s2619_s11 = inlined_call_operand.vmem [shape: f32[8,16], index: 11, kind: input, shape index: {}]   ;;  %s2620_s12 = inlined_call_operand.vmem [shape: f32[1,16], index: 12, kind: input, shape index: {}]   ;;  %s2621_s13 = inlined_call_operand.vmem [shape: f32[48,16], index: 13, kind: input, shape index: {}]   ;;  %s2622_s14 = inlined_call_operand.vmem [shape: f32[1,16], index: 14, kind: input, shape index: {}]   ;;  %s2623_s15 = inlined_call_operand.vmem [shape: f32[48,16], index: 15, kind: input, shape index: {}]   ;;  %s2624_s16 = inlined_call_operand.vmem [shape: f32[1,16], index: 16, kind: input, shape index: {}]   ;;  %s2625_s17 = inlined_call_operand.vmem [shape: f32[256,16], index: 17, kind: input, shape index: {}]   ;;  %s2626_s18 = inlined_call_operand.vmem [shape: f32[1,16], index: 18, kind: input, shape index: {}]   ;;  %s2627_s19 = inlined_call_operand.vmem [shape: f32[16,3], index: 19, kind: input, shape index: {}]   ;;  %s2628_s20 = inlined_call_operand.vmem [shape: f32[1,3], index: 20, kind: input, shape index: {}]   ;;  %s2629_s21 = inlined_call_operand.hbm [shape: f32[1,2,3], index: 21, kind: output, shape index: {}]  }
   0x1   :  { %2633 = sst [smem:[#allocation5_spill]] %s2608_s0 }
   0x2   :  { %2634 = sst [smem:[#allocation6_spill]] %s2609_s1 }
   0x3   :  { %2635 = sst [smem:[#allocation7_spill]] %s2610_s2 }
   0x4   :  { %2636 = sst [smem:[#allocation8_spill]] %s2611_s3 }
   0x5   :  { %2637 = sst [smem:[#allocation9_spill]] %s2612_s4 }
   0x6   :  { %2638 = sst [smem:[#allocation10_spill]] %s2613_s5 }
   0x7   :  { %s2639_s26 = sld [smem:[#allocation5_spill]]  ;;  %v69_v1 = vlaneseq  ;;  %s1993_s0 = smov 8   ;;  %vm190_vm0 = vcmask 1043456  }
   0x8   :  { %s2640_s23 = sld [smem:[#allocation6_spill]] }
   0x9   :  { %v2140_v8 = vshrl.u32 %v69_v1, 7 }
   0xd   :  { %v2118_v0 = vld [vmem:[%s2639_s26] sm:$0xff]  ;;  %v2123_v2 = vld [vmem:[%s2639_s26 + $0x8] sm:$0xff]  ;;  %v2128_v3 = vld [vmem:[%s2639_s26 + $0x18] sm:$0xff] }
   0xe   :  { %146 = vrot.lane.b32.xlu1 %v2118_v0, %s1993_s0  ;;  %v102_v4 = vrot.slane %v2118_v0, 6  ;;  %v103_v5 = vrot.slane %v2123_v2, 6  ;;  %v105_v6 = vrot.slane %v2128_v3, 6  ;;  %v2138_v7 = vld [vmem:[%s2639_s26 + $0x10] sm:$0xff]  ;;  %v169_v10 = vld [vmem:[%s2640_s23 + $0x8] sm:$0xf] }
   0xf   :  { %v104_v9 = vrot.slane %v2138_v7, 6 }
  0x10   :  { %26 = vsyncpa [#allocation3], 0  ;;  %vm106_vm1 = vcmp.lt.s32.totalorder %v2140_v8, 2  ;;  %1809 = vmatprep.subr.msk.mxu0 %vm190_vm0, %v169_v10  ;;  %v168_v11 = vld [vmem:[%s2640_s23] sm:$0xff]  ;;  %s1994_s2 = smov 4   ;;  %v81_v18 = vrot.slane %v2128_v3, 4 }
  0x11   :  { %v109_v12 = vsel %vm106_vm1, %v102_v4, %v103_v5  ;;  %v110_v13 = vsel %vm106_vm1, %v105_v6, %v102_v4  ;;  %v107_v14 = vsel %vm106_vm1, %v104_v9, %v105_v6  ;;  %1810 = vmatpush3.msk.msra.mxu0 %vm190_vm0, %v169_v10  ;;  %v108_v16 = vsel %vm106_vm1, %v103_v5, %v104_v9  ;;  %s2641_s27 = sld [smem:[#allocation8_spill]]  ;;  %s2000_s1 = smov 96  }
  0x12   :  { %148 = vrot.lane.b32.xlu1 %v2123_v2, %s1993_s0  ;;  %132 = vrot.lane.b32.xlu0 %v109_v12, %s1994_s2  ;;  %v122_v15 = vsel %vm106_vm1, 0.0, %v110_v13  ;;  %v78_v19 = vrot.slane %v2118_v0, 4  ;;  %v79_v20 = vrot.slane %v2123_v2, 4  ;;  %vm82_vm2 = vcmp.lt.s32.totalorder %v2140_v8, 4  ;;  %s2642_s30 = sld [smem:[#allocation10_spill]]  ;;  %s2001_s24 = smov 48  }
  0x13   :  { %1811 = vmatprep.subr.mxu0 %v168_v11  ;;  %vm158_vm3 = vcmask 31744   ;;  %vm163_vm4 = vcmask 64512   ;;  %v80_v28 = vrot.slane %v2138_v7, 4  ;;  %vm177_vm5 = vcmask 97280   ;;  %s2643_s23 = sld [smem:[#allocation7_spill]] }
  0x14   :  { %1812 = vmatpush3.msra.mxu0 %v168_v11  ;;  %v86_v22 = vsel %vm82_vm2, %v81_v18, %v78_v19  ;;  %v85_v24 = vsel %vm82_vm2, %v78_v19, %v79_v20  ;;  %vm343_vm6 = vcmask 130048   ;;  %vm358_vm7 = vcmask 195584  }
  0x15   :  { %v98_v25 = vsel %vm82_vm2, 0.0, %v86_v22  ;;  %v83_v33 = vsel %vm82_vm2, %v80_v28, %v81_v18  ;;  %v84_v35 = vsel %vm82_vm2, %v79_v20, %v80_v28  ;;  %vm803_vm8 = vcmask 261120  }
  0x16   :  { %136 = vrot.lane.b32.xlu1 %v107_v14, %s1994_s2  ;;  %130 = vrot.lane.b32.xlu0 %v122_v15, %s1994_s2  ;;  %vm821_vm9 = vcmask 392192   ;;  %vm1437_vm10 = vcmask 523264   ;;  %vm1439_vm11 = vcmask 654336   ;;  %vm1441_vm12 = vcmask 785408  }
  0x17   :  { %v350_v42 = vld [vmem:[%s2641_s27 + $0x10] sm:$0xff]  ;;  %v349_v43 = vld [vmem:[%s2641_s27 + $0x8] sm:$0xff]  ;;  %v348_v51 = vld [vmem:[%s2641_s27] sm:$0xff]  ;;  %s2644_s27 = sld [smem:[#allocation9_spill]]  ;;  %vm1443_vm13 = vcmask 916480   ;;  %vm2003_vm14 = vmmov 0  }
  0x18   :  { %v460_v44 = vld [vmem:[%s2642_s30] sm:$0xf]  ;;  %1819 = vmatprep.subr.mxu1 %v350_v42  ;;  %vm1650_vm15 = vcmask 17408  }
  0x19   :  { %v1666_v45 = vld [vmem:[%s2643_s23] ss:$0 sm:$0xff]  ;;  %1831 = vmatprep.subr.msk.mxu0 %vm190_vm0, %v460_v44  ;;  %1820 = vmatpush3.msra.mxu1 %v350_v42  ;;  %s1999_s23 = smov 80  }
  0x1a   :  { %152 = vrot.lane.b32.xlu1 %v2128_v3, %s1993_s0  ;;  %134 = vrot.lane.b32.xlu0 %v108_v16, %s1994_s2  ;;  %s1995_s2 = smov 16  }
  0x1b   :  { %1821 = vmatprep.subr.mxu1 %v349_v43 }
  0x1c   :  { %1822 = vmatpush3.msra.mxu1 %v349_v43 }
  0x1d   :  { %1823 = vmatprep.subr.mxu1 %v348_v51 }
  0x1e   :  { %150 = vrot.lane.b32.xlu0 %v2138_v7, %s1993_s0  ;;  %1824 = vmatpush3.msra.mxu1 %v348_v51 }
  0x80   :  { %v147_v17 = vpop.permute.xlu1 %146 }
  0x84   :  { %v149_v21 = vpop.permute.xlu1 %148  ;;  %v133_v23 = vpop.permute.xlu0 %132 }
  0x85   :  { %v160_v26 = vsel %vm158_vm3, %v85_v24, %v133_v23 }
  0x86   :  { %v165_v32 = vsel %vm163_vm4, %v160_v26, %v149_v21 }
  0x88   :  { %v131_v27 = vpop.permute.xlu0 %130  ;;  %v137_v30 = vpop.permute.xlu1 %136 }
  0x89   :  { %v159_v29 = vsel %vm158_vm3, %v98_v25, %v131_v27  ;;  %v162_v36 = vsel %vm158_vm3, %v83_v33, %v137_v30 }
  0x8a   :  { %v164_v31 = vsel %vm163_vm4, %v159_v29, %v147_v17 }
  0x8b   :  { %1813 = vmatprep.mubr.msk.f32.mxu0 %vm177_vm5, %v164_v31  ;;  %v1672_v31 = vld [vmem:[%s2644_s27] ss:$0 sm:$0xff] }
  0x8c   :  { %v135_v34 = vpop.permute.xlu0 %134  ;;  %1814 = vmatmul.mubr.msk.f32.vlgmr.msra.gmra.mxu0 %vm177_vm5, %v165_v32  ;;  %v153_v37 = vpop.permute.xlu1 %152  ;;  %v1677_v32 = vld [vmem:[%s2614_s6] ss:$0 sm:$0xff]  ;;  %s1996_s6 = smov 32  }
  0x8d   :  { %v161_v38 = vsel %vm158_vm3, %v84_v35, %v135_v34  ;;  %v167_v41 = vsel %vm163_vm4, %v162_v36, %v153_v37  ;;  %1832 = vmatpush3.msk.msra.mxu0 %vm190_vm0, %v460_v44 }
  0x90   :  { %v151_v39 = vpop.permute.xlu0 %150 }
  0x91   :  { %v166_v40 = vsel %vm163_vm4, %v161_v38, %v151_v39  ;;  %v642_v38 = vld [vmem:[%s2615_s7 + $0x10] sm:$0xff]  ;;  %v641_v39 = vld [vmem:[%s2615_s7 + $0x8] sm:$0xff] }
  0x92   :  { %1816 = vmatprep.mubr.msk.f32.mxu0 %vm177_vm5, %v166_v40  ;;  %1839 = vmatprep.subr.mxu1 %v642_v38 }
  0x93   :  { %1817 = vmatmul.mubr.msk.f32.gmra.mxu0 %vm177_vm5, %v167_v41 }
  0x94   :  { %1833 = vmatprep.mubr.msk.f32.mxu0 %vm158_vm3, %v2118_v0 }
  0x97   :  { %1834 = vmatmul.mubr.msk.f32.vlgmr.msra.gmra.mxu0 %vm158_vm3, %v2123_v2 }
  0x98   :  { %1836 = vmatprep.mubr.msk.f32.mxu0 %vm158_vm3, %v2138_v7 }
  0x9b   :  { %1837 = vmatmul.mubr.msk.f32.gmra.mxu0 %vm158_vm3, %v2128_v3 }
 0x14c   :  { %v1815_v46 = vpop.f32.mrf.mxu0 }
 0x14d   :  { %v266_v47 = vadd.f32 %v1815_v46, %v1666_v45 }
 0x14e   :  { %v260_v48 = vpop.f32.mrf.mxu0 }
 0x14f   :  { %v280_v49 = vmax.f32 %v266_v47, 0.0  ;;  %v261_v50 = vadd.f32 %v1666_v45, %v260_v48 }
 0x151   :  { %v279_v52 = vmax.f32 %v261_v50, 0.0  ;;  %329 = vrot.lane.b32.xlu1 %v280_v49, %s1995_s2  ;;  %v284_v53 = vrot.slane %v280_v49, 4  ;;  %v296_v54 = vrot.slane %v280_v49, 6  ;;  %v640_v49 = vld [vmem:[%s2615_s7] sm:$0xff] }
 0x153   :  { %v283_v55 = vrot.slane %v279_v52, 4  ;;  %v295_v56 = vrot.slane %v279_v52, 6  ;;  %327 = vrot.lane.b32.xlu0 %v279_v52, %s1995_s2  ;;  %v1818_v57 = vpop.f32.mrf.mxu0 }
 0x154   :  { %v276_v58 = vadd.f32 %v1818_v57, %v1666_v45 }
 0x155   :  { %v270_v59 = vpop.f32.mrf.mxu0  ;;  %v301_v60 = vsel %vm106_vm1, %v295_v56, %v296_v54  ;;  %v289_v61 = vsel %vm82_vm2, %v283_v55, %v284_v53 }
 0x156   :  { %v282_v62 = vmax.f32 %v276_v58, 0.0  ;;  %v271_v63 = vadd.f32 %v1666_v45, %v270_v59  ;;  %313 = vrot.lane.b32.xlu1 %v301_v60, %s1993_s0 }
 0x157   :  { %v1835_v30 = vpop.f32.mrf.mxu0 }
 0x158   :  { %v286_v0 = vrot.slane %v282_v62, 4  ;;  %v298_v1 = vrot.slane %v282_v62, 6  ;;  %v281_v2 = vmax.f32 %v271_v63, 0.0  ;;  %v551_v36 = vadd.f32 %v1835_v30, %v1677_v32  ;;  %v810_v30 = vld [vmem:[%s2617_s9 + $0x10] sm:$0xff] }
 0x159   :  { %v545_v34 = vpop.f32.mrf.mxu0 }
 0x15a   :  { %v285_v3 = vrot.slane %v281_v2, 4  ;;  %v297_v4 = vrot.slane %v281_v2, 6  ;;  %v302_v5 = vsel %vm106_vm1, %v298_v1, %v295_v56  ;;  %v290_v6 = vsel %vm82_vm2, %v286_v0, %v283_v55 }
 0x15b   :  { %v303_v7 = vsel %vm106_vm1, 0.0, %v302_v5  ;;  %v291_v18 = vsel %vm82_vm2, 0.0, %v290_v6  ;;  %v546_v42 = vadd.f32 %v1677_v32, %v545_v34  ;;  %v1838_v45 = vpop.f32.mrf.mxu0  ;;  %v923_v5 = vld [vmem:[%s2619_s11] sm:$0xff] }
 0x15c   :  { %311 = vrot.lane.b32.xlu0 %v303_v7, %s1993_s0  ;;  %v299_v9 = vsel %vm106_vm1, %v297_v4, %v298_v1  ;;  %v287_v10 = vsel %vm82_vm2, %v285_v3, %v286_v0  ;;  %v288_v11 = vsel %vm82_vm2, %v284_v53, %v285_v3  ;;  %v300_v12 = vsel %vm106_vm1, %v296_v54, %v297_v4 }
 0x15d   :  { %317 = vrot.lane.b32.xlu1 %v299_v9, %s1993_s0  ;;  %v561_v51 = vadd.f32 %v1838_v45, %v1677_v32  ;;  %v555_v53 = vpop.f32.mrf.mxu0 }
 0x15e   :  { %v556_v60 = vadd.f32 %v1677_v32, %v555_v53 }
 0x160   :  { %315 = vrot.lane.b32.xlu0 %v300_v12, %s1993_s0 }
 0x161   :  { %333 = vrot.lane.b32.xlu1 %v282_v62, %s1995_s2 }
 0x164   :  { %331 = vrot.lane.b32.xlu0 %v281_v2, %s1995_s2 }
 0x1c3   :  { %v330_v13 = vpop.permute.xlu1 %329 }
 0x1c5   :  { %v328_v14 = vpop.permute.xlu0 %327 }
 0x1c8   :  { %v314_v15 = vpop.permute.xlu1 %313 }
 0x1c9   :  { %v340_v16 = vsel %vm163_vm4, %v289_v61, %v314_v15 }
 0x1ca   :  { %v345_v22 = vsel %vm343_vm6, %v340_v16, %v330_v13 }
 0x1ce   :  { %v312_v17 = vpop.permute.xlu0 %311 }
 0x1cf   :  { %v339_v19 = vsel %vm163_vm4, %v291_v18, %v312_v17  ;;  %v318_v20 = vpop.permute.xlu1 %317 }
 0x1d0   :  { %v344_v21 = vsel %vm343_vm6, %v339_v19, %v328_v14  ;;  %v342_v27 = vsel %vm163_vm4, %v287_v10, %v318_v20 }
 0x1d1   :  { %1825 = vmatprep.mubr.msk.f32.mxu1 %vm358_vm7, %v344_v21 }
 0x1d2   :  { %1826 = vmatmul.mubr.msk.f32.vlgmr.msra.gmra.mxu1 %vm358_vm7, %v345_v22  ;;  %v316_v23 = vpop.permute.xlu0 %315 }
 0x1d3   :  { %v334_v24 = vpop.permute.xlu1 %333  ;;  %v341_v25 = vsel %vm163_vm4, %v288_v11, %v316_v23  ;;  %1840 = vmatpush3.msra.mxu1 %v642_v38 }
 0x1d4   :  { %v347_v29 = vsel %vm343_vm6, %v342_v27, %v334_v24  ;;  %1841 = vmatprep.subr.mxu1 %v641_v39  ;;  %v812_v27 = vld [vmem:[%s2617_s9 + $0x20] sm:$0xff] }
 0x1d5   :  { %1842 = vmatpush3.msra.mxu1 %v641_v39 }
 0x1d6   :  { %v332_v26 = vpop.permute.xlu0 %331  ;;  %1843 = vmatprep.subr.mxu1 %v640_v49 }
 0x1d7   :  { %v346_v28 = vsel %vm343_vm6, %v341_v25, %v332_v26  ;;  %1844 = vmatpush3.msra.mxu1 %v640_v49  ;;  %v813_v26 = vld [vmem:[%s2617_s9 + $0x28] sm:$0xff] }
 0x1d8   :  { %1828 = vmatprep.mubr.msk.f32.mxu1 %vm358_vm7, %v346_v28  ;;  %1869 = vmatprep.subr.mxu1 %v923_v5  ;;  %v811_v28 = vld [vmem:[%s2617_s9 + $0x18] sm:$0xff] }
 0x1d9   :  { %1829 = vmatmul.mubr.msk.f32.gmra.mxu1 %vm358_vm7, %v347_v29  ;;  %1851 = vmatprep.subr.mxu0 %v813_v26  ;;  %v1683_v29 = vld [vmem:[%s2616_s8] ss:$0 sm:$0xff] }
 0x1da   :  { %1852 = vmatpush3.msra.mxu0 %v813_v26 }
 0x1db   :  { %1853 = vmatprep.subr.mxu0 %v812_v27 }
 0x1dc   :  { %1854 = vmatpush3.msra.mxu0 %v812_v27 }
 0x1dd   :  { %1855 = vmatprep.subr.mxu0 %v811_v28 }
 0x1de   :  { %1856 = vmatpush3.msra.mxu0 %v811_v28 }
 0x1df   :  { %1857 = vmatprep.subr.mxu0 %v810_v30 }
 0x1e0   :  { %1858 = vmatpush3.msra.mxu0 %v810_v30 }
 0x292   :  { %v1827_v33 = vpop.f32.mrf.mxu1 }
 0x293   :  { %v443_v35 = vadd.f32 %v1827_v33, %v1672_v31 }
 0x294   :  { %v437_v37 = vpop.f32.mrf.mxu1 }
 0x295   :  { %v457_v40 = vmax.f32 %v443_v35, 0.0  ;;  %v438_v41 = vadd.f32 %v1672_v31, %v437_v37  ;;  %v808_v37 = vld [vmem:[%s2617_s9] sm:$0xff] }
 0x297   :  { %v456_v43 = vmax.f32 %v438_v41, 0.0  ;;  %v565_v44 = vadd.f32 %v551_v36, %v457_v40 }
 0x299   :  { %v569_v46 = vmax.f32 %v565_v44, 0.0  ;;  %v564_v47 = vadd.f32 %v546_v42, %v456_v43  ;;  %v1830_v48 = vpop.f32.mrf.mxu1 }
 0x29a   :  { %v453_v50 = vadd.f32 %v1830_v48, %v1672_v31 }
 0x29b   :  { %v568_v52 = vmax.f32 %v564_v47, 0.0  ;;  %622 = vrot.lane.b32.xlu1 %v569_v46, %s1995_s2  ;;  %v447_v54 = vpop.f32.mrf.mxu1  ;;  %v589_v58 = vrot.slane %v569_v46, 4 }
 0x29c   :  { %v459_v55 = vmax.f32 %v453_v50, 0.0  ;;  %v448_v56 = vadd.f32 %v1672_v31, %v447_v54  ;;  %v809_v31 = vld [vmem:[%s2617_s9 + $0x8] sm:$0xff] }
 0x29d   :  { %620 = vrot.lane.b32.xlu0 %v568_v52, %s1995_s2  ;;  %v588_v57 = vrot.slane %v568_v52, 4  ;;  %1859 = vmatprep.subr.mxu0 %v809_v31 }
 0x29e   :  { %v567_v59 = vadd.f32 %v561_v51, %v459_v55  ;;  %v458_v61 = vmax.f32 %v448_v56, 0.0  ;;  %1860 = vmatpush3.msra.mxu0 %v809_v31 }
 0x29f   :  { %v594_v62 = vsel %vm82_vm2, %v588_v57, %v589_v58  ;;  %1861 = vmatprep.subr.mxu0 %v808_v37 }
 0x2a0   :  { %v571_v63 = vmax.f32 %v567_v59, 0.0  ;;  %v566_v0 = vadd.f32 %v556_v60, %v458_v61  ;;  %606 = vrot.lane.b32.xlu1 %v594_v62, %s1993_s0  ;;  %1862 = vmatpush3.msra.mxu0 %v808_v37 }
 0x2a2   :  { %v570_v1 = vmax.f32 %v566_v0, 0.0  ;;  %v591_v2 = vrot.slane %v571_v63, 4 }
 0x2a4   :  { %v595_v3 = vsel %vm82_vm2, %v591_v2, %v588_v57  ;;  %v590_v4 = vrot.slane %v570_v1, 4 }
 0x2a5   :  { %v596_v6 = vsel %vm82_vm2, 0.0, %v595_v3 }
 0x2a6   :  { %604 = vrot.lane.b32.xlu0 %v596_v6, %s1993_s0  ;;  %v592_v7 = vsel %vm82_vm2, %v590_v4, %v591_v2  ;;  %v593_v9 = vsel %vm82_vm2, %v589_v58, %v590_v4  ;;  %v1097_v6 = vld [vmem:[%s2621_s13 + $0x28] sm:$0xff] }
 0x2a7   :  { %610 = vrot.lane.b32.xlu1 %v592_v7, %s1993_s0  ;;  %v1096_v7 = vld [vmem:[%s2621_s13 + $0x20] sm:$0xff]  ;;  %1877 = vmatprep.subr.mxu0 %v1097_v6 }
 0x2aa   :  { %608 = vrot.lane.b32.xlu0 %v593_v9, %s1993_s0  ;;  %v1095_v9 = vld [vmem:[%s2621_s13 + $0x18] sm:$0xff] }
 0x2ab   :  { %626 = vrot.lane.b32.xlu1 %v571_v63, %s1995_s2 }
 0x2ae   :  { %624 = vrot.lane.b32.xlu0 %v570_v1, %s1995_s2 }
 0x30d   :  { %v623_v10 = vpop.permute.xlu1 %622 }
 0x30f   :  { %v621_v11 = vpop.permute.xlu0 %620 }
 0x312   :  { %v607_v12 = vpop.permute.xlu1 %606 }
 0x313   :  { %v633_v13 = vsel %vm163_vm4, %v568_v52, %v607_v12 }
 0x314   :  { %v637_v18 = vsel %vm343_vm6, %v633_v13, %v623_v10  ;;  %v1094_v10 = vld [vmem:[%s2621_s13 + $0x10] sm:$0xff]  ;;  %v1688_v13 = vld [vmem:[%s2618_s10] ss:$0 sm:$0xff]  ;;  %s1998_s10 = smov 64  }
 0x318   :  { %v605_v14 = vpop.permute.xlu0 %604 }
 0x319   :  { %v632_v15 = vsel %vm163_vm4, 0.0, %v605_v14  ;;  %v611_v16 = vpop.permute.xlu1 %610  ;;  %v1092_v14 = vld [vmem:[%s2621_s13] sm:$0xff] }
 0x31a   :  { %v636_v17 = vsel %vm343_vm6, %v632_v15, %v621_v11  ;;  %v635_v23 = vsel %vm163_vm4, %v570_v1, %v611_v16  ;;  %v1093_v11 = vld [vmem:[%s2621_s13 + $0x8] sm:$0xff]  ;;  %v1693_v15 = vld [vmem:[%s2620_s12] ss:$0 sm:$0xff] }
 0x31b   :  { %1845 = vmatprep.mubr.msk.f32.mxu1 %vm358_vm7, %v636_v17 }
 0x31c   :  { %1846 = vmatmul.mubr.msk.f32.vlgmr.msra.gmra.mxu1 %vm358_vm7, %v637_v18  ;;  %v609_v19 = vpop.permute.xlu0 %608 }
 0x31d   :  { %1870 = vmatpush3.msra.mxu1 %v923_v5  ;;  %v627_v20 = vpop.permute.xlu1 %626  ;;  %v634_v21 = vsel %vm163_vm4, %v569_v46, %v609_v19  ;;  %v1997_v5 = vmov 0.0  }
 0x31e   :  { %v639_v25 = vsel %vm343_vm6, %v635_v23, %v627_v20 }
 0x320   :  { %v625_v22 = vpop.permute.xlu0 %624 }
 0x321   :  { %v638_v24 = vsel %vm343_vm6, %v634_v21, %v625_v22 }
 0x322   :  { %1848 = vmatprep.mubr.msk.f32.mxu1 %vm358_vm7, %v638_v24 }
 0x323   :  { %1849 = vmatmul.mubr.msk.f32.gmra.mxu1 %vm358_vm7, %v639_v25 }
 0x324   :  { %1871 = vmatprep.mubr.msk.f32.mxu1 %vm163_vm4, %v568_v52 }
 0x327   :  { %1872 = vmatmul.mubr.msk.f32.vlgmr.msra.gmra.mxu1 %vm163_vm4, %v569_v46 }
 0x328   :  { %1874 = vmatprep.mubr.msk.f32.mxu1 %vm163_vm4, %v570_v1 }
 0x32b   :  { %1875 = vmatmul.mubr.msk.f32.gmra.mxu1 %vm163_vm4, %v571_v63 }
 0x3dc   :  { %v1847_v32 = vpop.f32.mrf.mxu1 }
 0x3dd   :  { %v734_v33 = vadd.f32 %v1847_v32, %v1683_v29 }
 0x3de   :  { %v728_v34 = vpop.f32.mrf.mxu1 }
 0x3df   :  { %v748_v35 = vmax.f32 %v734_v33, 0.0  ;;  %v729_v36 = vadd.f32 %v1683_v29, %v728_v34 }
 0x3e1   :  { %v747_v38 = vmax.f32 %v729_v36, 0.0  ;;  %789 = vrot.lane.b32.xlu1 %v748_v35, %s1996_s6  ;;  %v756_v39 = vrot.slane %v748_v35, 4 }
 0x3e3   :  { %v755_v40 = vrot.slane %v747_v38, 4  ;;  %787 = vrot.lane.b32.xlu0 %v747_v38, %s1996_s6  ;;  %v1850_v41 = vpop.f32.mrf.mxu1 }
 0x3e4   :  { %v744_v42 = vadd.f32 %v1850_v41, %v1683_v29 }
 0x3e5   :  { %v738_v43 = vpop.f32.mrf.mxu1  ;;  %v761_v44 = vsel %vm82_vm2, %v755_v40, %v756_v39 }
 0x3e6   :  { %v750_v45 = vmax.f32 %v744_v42, 0.0  ;;  %v739_v46 = vadd.f32 %v1683_v29, %v738_v43  ;;  %773 = vrot.lane.b32.xlu1 %v761_v44, %s1995_s2 }
 0x3e7   :  { %v1873_v12 = vpop.f32.mrf.mxu1 }
 0x3e8   :  { %v758_v47 = vrot.slane %v750_v45, 4  ;;  %v749_v48 = vmax.f32 %v739_v46, 0.0  ;;  %v1011_v20 = vadd.f32 %v1873_v12, %v1693_v15 }
 0x3e9   :  { %v1005_v17 = vpop.f32.mrf.mxu1 }
 0x3ea   :  { %v757_v49 = vrot.slane %v749_v48, 4  ;;  %v762_v50 = vsel %vm82_vm2, %v758_v47, %v755_v40  ;;  %v1006_v23 = vadd.f32 %v1693_v15, %v1005_v17 }
 0x3eb   :  { %v763_v51 = vsel %vm82_vm2, 0.0, %v762_v50  ;;  %v1876_v24 = vpop.f32.mrf.mxu1 }
 0x3ec   :  { %771 = vrot.lane.b32.xlu0 %v763_v51, %s1995_s2  ;;  %v759_v52 = vsel %vm82_vm2, %v757_v49, %v758_v47  ;;  %v760_v53 = vsel %vm82_vm2, %v756_v39, %v757_v49 }
 0x3ed   :  { %777 = vrot.lane.b32.xlu1 %v759_v52, %s1995_s2  ;;  %v1015_v31 = vpop.f32.mrf.mxu1 }
 0x3f0   :  { %775 = vrot.lane.b32.xlu0 %v760_v53, %s1995_s2 }
 0x3f1   :  { %793 = vrot.lane.b32.xlu1 %v750_v45, %s1996_s6 }
 0x3f4   :  { %791 = vrot.lane.b32.xlu0 %v749_v48, %s1996_s6 }
 0x3f8   :  { %1056 = vrot.lane.b32.xlu0 %v1997_v5, %s1995_s2 }
 0x453   :  { %v790_v54 = vpop.permute.xlu1 %789 }
 0x455   :  { %v788_v55 = vpop.permute.xlu0 %787 }
 0x458   :  { %v774_v56 = vpop.permute.xlu1 %773 }
 0x459   :  { %v800_v57 = vsel %vm343_vm6, %v747_v38, %v774_v56  ;;  %v1021_v38 = vadd.f32 %v1876_v24, %v1693_v15 }
 0x45a   :  { %v805_v61 = vsel %vm803_vm8, %v800_v57, %v790_v54 }
 0x45e   :  { %v772_v58 = vpop.permute.xlu0 %771 }
 0x45f   :  { %v799_v59 = vsel %vm343_vm6, 0.0, %v772_v58  ;;  %v778_v60 = vpop.permute.xlu1 %777 }
 0x460   :  { %v804_v8 = vsel %vm803_vm8, %v799_v59, %v788_v55  ;;  %v802_v2 = vsel %vm343_vm6, %v749_v48, %v778_v60  ;;  %v1259_v59 = vld [vmem:[%s2623_s15 + $0x28] sm:$0xff]  ;;  %v1258_v60 = vld [vmem:[%s2623_s15 + $0x20] sm:$0xff] }
 0x461   :  { %1863 = vmatprep.mubr.msk.f32.mxu0 %vm821_vm9, %v804_v8  ;;  %v1257_v8 = vld [vmem:[%s2623_s15 + $0x18] sm:$0xff] }
 0x462   :  { %v776_v62 = vpop.permute.xlu0 %775  ;;  %1864 = vmatmul.mubr.msk.f32.vlgmr.msra.gmra.mxu0 %vm821_vm9, %v805_v61  ;;  %v1256_v61 = vld [vmem:[%s2623_s15 + $0x10] sm:$0xff] }
 0x463   :  { %v794_v63 = vpop.permute.xlu1 %793  ;;  %v801_v0 = vsel %vm343_vm6, %v748_v35, %v776_v62  ;;  %1878 = vmatpush3.msra.mxu0 %v1097_v6  ;;  %v1016_v35 = vadd.f32 %v1693_v15, %v1015_v31  ;;  %v1255_v62 = vld [vmem:[%s2623_s15 + $0x8] sm:$0xff] }
 0x464   :  { %v807_v4 = vsel %vm803_vm8, %v802_v2, %v794_v63  ;;  %1879 = vmatprep.subr.mxu0 %v1096_v7  ;;  %v1254_v63 = vld [vmem:[%s2623_s15] sm:$0xff] }
 0x465   :  { %1880 = vmatpush3.msra.mxu0 %v1096_v7 }
 0x466   :  { %v792_v1 = vpop.permute.xlu0 %791  ;;  %1881 = vmatprep.subr.mxu0 %v1095_v9 }
 0x467   :  { %v806_v3 = vsel %vm803_vm8, %v801_v0, %v792_v1  ;;  %1882 = vmatpush3.msra.mxu0 %v1095_v9  ;;  %v1698_v0 = vld [vmem:[%s2622_s14] ss:$0 sm:$0xff] }
 0x468   :  { %1866 = vmatprep.mubr.msk.f32.mxu0 %vm821_vm9, %v806_v3  ;;  %1883 = vmatprep.subr.mxu0 %v1094_v10 }
 0x469   :  { %1867 = vmatmul.mubr.msk.f32.gmra.mxu0 %vm821_vm9, %v807_v4 }
 0x46a   :  { %1884 = vmatpush3.msra.mxu0 %v1094_v10  ;;  %v1057_v43 = vpop.permute.xlu0 %1056 }
 0x46b   :  { %1885 = vmatprep.subr.mxu0 %v1093_v11  ;;  %v1084_v46 = vsel %vm343_vm6, 0.0, %v1057_v43  ;;  %v1464_v43 = vld [vmem:[%s2625_s17 + $0x60] sm:$0xff] }
 0x46c   :  { %1886 = vmatpush3.msra.mxu0 %v1093_v11 }
 0x46d   :  { %1887 = vmatprep.subr.mxu0 %v1092_v14 }
 0x46e   :  { %1888 = vmatpush3.msra.mxu0 %v1092_v14 }
 0x46f   :  { %1895 = vmatprep.subr.mxu0 %v1259_v59 }
 0x522   :  { %v1865_v16 = vpop.f32.mrf.mxu0 }
 0x523   :  { %v906_v18 = vadd.f32 %v1865_v16, %v1688_v13 }
 0x524   :  { %v900_v19 = vpop.f32.mrf.mxu0 }
 0x525   :  { %v920_v21 = vmax.f32 %v906_v18, 0.0  ;;  %v901_v22 = vadd.f32 %v1688_v13, %v900_v19 }
 0x527   :  { %v1025_v25 = vadd.f32 %v1011_v20, %v920_v21  ;;  %v919_v26 = vmax.f32 %v901_v22, 0.0 }
 0x529   :  { %v2389_v27 = vmax.f32 %v1025_v25, 0.0  ;;  %v1024_v28 = vadd.f32 %v1006_v23, %v919_v26  ;;  %v1868_v29 = vpop.f32.mrf.mxu0 }
 0x52a   :  { %v916_v30 = vadd.f32 %v1868_v29, %v1688_v13 }
 0x52b   :  { %1060 = vrot.lane.b32.xlu0 %v2389_v27, %s1995_s2  ;;  %1074 = vrot.lane.b32.xlu1 %v2389_v27, %s1996_s6  ;;  %v910_v32 = vpop.f32.mrf.mxu0  ;;  %v2395_v34 = vmax.f32 %v1024_v28, 0.0 }
 0x52c   :  { %v911_v33 = vadd.f32 %v1688_v13, %v910_v32  ;;  %v922_v36 = vmax.f32 %v916_v30, 0.0  ;;  %v1483_v32 = vld [vmem:[%s2625_s17 + $0xf8] sm:$0xff] }
 0x52d   :  { %1771 = vmatprep.subr.mxu1 %v1483_v32 }
 0x52e   :  { %v921_v37 = vmax.f32 %v911_v33, 0.0  ;;  %v2401_v40 = vadd.f32 %v1021_v38, %v922_v36  ;;  %v1467_v33 = vld [vmem:[%s2625_s17 + $0x78] sm:$0xff]  ;;  %v1466_v36 = vld [vmem:[%s2625_s17 + $0x70] sm:$0xff]  ;;  %v1465_v38 = vld [vmem:[%s2625_s17 + $0x68] sm:$0xff] }
 0x52f   :  { %1072 = vrot.lane.b32.xlu0 %v2395_v34, %s1996_s6  ;;  %1058 = vrot.lane.b32.xlu1 %v2395_v34, %s1995_s2 }
 0x530   :  { %v1026_v39 = vadd.f32 %v1016_v35, %v921_v37  ;;  %v1031_v42 = vmax.f32 %v2401_v40, 0.0  ;;  %v1482_v35 = vld [vmem:[%s2625_s17 + $0xf0] sm:$0xff]  ;;  %1772 = vmatpush3.msra.mxu1 %v1467_v33  ;;  %v1481_v37 = vld [vmem:[%s2625_s17 + $0xe8] sm:$0xff] }
 0x531   :  { %1773 = vmatprep.subr.mxu1 %v1482_v35 }
 0x532   :  { %v2403_v41 = vmax.f32 %v1026_v39, 0.0  ;;  %1774 = vmatpush3.msra.mxu1 %v1466_v36  ;;  %v1480_v39 = vld [vmem:[%s2625_s17 + $0xe0] sm:$0xff] }
 0x533   :  { %1775 = vmatprep.subr.mxu1 %v1481_v37 }
 0x534   :  { %1076 = vrot.lane.b32.xlu0 %v2403_v41, %s1996_s6  ;;  %1062 = vrot.lane.b32.xlu1 %v2403_v41, %s1995_s2 }
 0x535   :  { %1776 = vmatpush3.msra.mxu1 %v1465_v38 }
 0x536   :  { %1777 = vmatprep.subr.mxu1 %v1480_v39 }
 0x537   :  { %1778 = vmatpush3.msra.mxu1 %v1464_v43 }
 0x538   :  { %1078 = vrot.lane.b32.xlu1 %v1031_v42, %s1996_s6  ;;  %1218 = vrot.lane.b32.xlu0 %v1997_v5, %s1995_s2 }
 0x59d   :  { %v1061_v44 = vpop.permute.xlu0 %1060  ;;  %v1075_v45 = vpop.permute.xlu1 %1074 }
 0x59e   :  { %v1086_v52 = vsel %vm343_vm6, %v2395_v34, %v1061_v44  ;;  %v1479_v44 = vld [vmem:[%s2625_s17 + $0xd8] sm:$0xff] }
 0x59f   :  { %1779 = vmatprep.subr.mxu1 %v1479_v44 }
 0x5a1   :  { %v1073_v47 = vpop.permute.xlu0 %1072  ;;  %v1059_v48 = vpop.permute.xlu1 %1058 }
 0x5a2   :  { %v1088_v49 = vsel %vm803_vm8, %v1084_v46, %v1073_v47  ;;  %v1085_v50 = vsel %vm343_vm6, 0.0, %v1059_v48  ;;  %v1478_v46 = vld [vmem:[%s2625_s17 + $0xd0] sm:$0xff]  ;;  %v1477_v48 = vld [vmem:[%s2625_s17 + $0xc8] sm:$0xff] }
 0x5a3   :  { %v1089_v51 = vsel %vm803_vm8, %v1085_v50, %v1075_v45  ;;  %1889 = vmatprep.mubr.msk.f32.mxu0 %vm821_vm9, %v1088_v49  ;;  %v1463_v45 = vld [vmem:[%s2625_s17 + $0x58] sm:$0xff]  ;;  %v1462_v47 = vld [vmem:[%s2625_s17 + $0x50] sm:$0xff]  ;;  %v1461_v49 = vld [vmem:[%s2625_s17 + $0x48] sm:$0xff] }
 0x5a4   :  { %1890 = vmatmul.mubr.msk.f32.vlgmr.msra.gmra.mxu0 %vm821_vm9, %v1089_v51  ;;  %1780 = vmatpush3.msra.mxu1 %v1463_v45  ;;  %v1703_v50 = vld [vmem:[%s2624_s16] ss:$0 sm:$0xff] }
 0x5a5   :  { %1896 = vmatpush3.msra.mxu0 %v1259_v59  ;;  %1781 = vmatprep.subr.mxu1 %v1478_v46 }
 0x5a6   :  { %v1077_v53 = vpop.permute.xlu0 %1076  ;;  %v1063_v54 = vpop.permute.xlu1 %1062  ;;  %1897 = vmatprep.subr.mxu0 %v1258_v60  ;;  %1782 = vmatpush3.msra.mxu1 %v1462_v47 }
 0x5a7   :  { %v1090_v55 = vsel %vm803_vm8, %v1086_v52, %v1077_v53  ;;  %v1087_v56 = vsel %vm343_vm6, %v2389_v27, %v1063_v54  ;;  %1898 = vmatpush3.msra.mxu0 %v1258_v60  ;;  %1783 = vmatprep.subr.mxu1 %v1477_v48  ;;  %v1475_v60 = vld [vmem:[%s2625_s17 + $0xb8] sm:$0xff] }
 0x5a8   :  { %1892 = vmatprep.mubr.msk.f32.mxu0 %vm821_vm9, %v1090_v55  ;;  %1899 = vmatprep.subr.mxu0 %v1257_v8 }
 0x5a9   :  { %1900 = vmatpush3.msra.mxu0 %v1257_v8  ;;  %1784 = vmatpush3.msra.mxu1 %v1461_v49  ;;  %v1459_v8 = vld [vmem:[%s2625_s17 + $0x38] sm:$0xff] }
 0x5aa   :  { %v1079_v57 = vpop.permute.xlu1 %1078  ;;  %1901 = vmatprep.subr.mxu0 %v1256_v61  ;;  %v1219_v15 = vpop.permute.xlu0 %1218 }
 0x5ab   :  { %v1091_v58 = vsel %vm803_vm8, %v1087_v56, %v1079_v57  ;;  %1902 = vmatpush3.msra.mxu0 %v1256_v61  ;;  %v1246_v18 = vsel %vm343_vm6, 0.0, %v1219_v15  ;;  %v1476_v56 = vld [vmem:[%s2625_s17 + $0xc0] sm:$0xff] }
 0x5ac   :  { %1893 = vmatmul.mubr.msk.f32.gmra.mxu0 %vm821_vm9, %v1091_v58  ;;  %1903 = vmatprep.subr.mxu0 %v1255_v62  ;;  %v1460_v57 = vld [vmem:[%s2625_s17 + $0x40] sm:$0xff] }
 0x5ad   :  { %1904 = vmatpush3.msra.mxu0 %v1255_v62  ;;  %1785 = vmatprep.subr.mxu1 %v1476_v56 }
 0x5ae   :  { %1905 = vmatprep.subr.mxu0 %v1254_v63  ;;  %1786 = vmatpush3.msra.mxu1 %v1460_v57 }
 0x5af   :  { %1906 = vmatpush3.msra.mxu0 %v1254_v63  ;;  %1787 = vmatprep.subr.mxu1 %v1475_v60 }
 0x5b0   :  { %1913 = vmatprep.subr.mxu0 %v1997_v5  ;;  %1788 = vmatpush3.msra.mxu1 %v1459_v8 }
 0x664   :  { %v1891_v1 = vpop.f32.mrf.mxu0 }
 0x665   :  { %v1189_v2 = vadd.f32 %v1891_v1, %v1698_v0  ;;  %v1458_v1 = vld [vmem:[%s2625_s17 + $0x30] sm:$0xff] }
 0x666   :  { %v1183_v3 = vpop.f32.mrf.mxu0 }
 0x667   :  { %v1203_v4 = vmax.f32 %v1189_v2, 0.0  ;;  %v1184_v6 = vadd.f32 %v1698_v0, %v1183_v3 }
 0x669   :  { %1222 = vrot.lane.b32.xlu0 %v1203_v4, %s1995_s2  ;;  %1236 = vrot.lane.b32.xlu1 %v1203_v4, %s1996_s6  ;;  %v1202_v7 = vmax.f32 %v1184_v6, 0.0 }
 0x66c   :  { %v1894_v9 = vpop.f32.mrf.mxu0 }
 0x66d   :  { %1234 = vrot.lane.b32.xlu0 %v1202_v7, %s1996_s6  ;;  %1220 = vrot.lane.b32.xlu1 %v1202_v7, %s1995_s2  ;;  %v1199_v12 = vadd.f32 %v1894_v9, %v1698_v0 }
 0x66e   :  { %v1193_v10 = vpop.f32.mrf.mxu0 }
 0x66f   :  { %v1194_v11 = vadd.f32 %v1698_v0, %v1193_v10  ;;  %v1205_v14 = vmax.f32 %v1199_v12, 0.0  ;;  %v1474_v0 = vld [vmem:[%s2625_s17 + $0xb0] sm:$0xff]  ;;  %v1457_v10 = vld [vmem:[%s2625_s17 + $0x28] sm:$0xff] }
 0x670   :  { %1789 = vmatprep.subr.mxu1 %v1474_v0 }
 0x671   :  { %v1204_v13 = vmax.f32 %v1194_v11, 0.0  ;;  %1790 = vmatpush3.msra.mxu1 %v1458_v1  ;;  %v1456_v11 = vld [vmem:[%s2625_s17 + $0x20] sm:$0xff] }
 0x673   :  { %1238 = vrot.lane.b32.xlu0 %v1204_v13, %s1996_s6  ;;  %1224 = vrot.lane.b32.xlu1 %v1204_v13, %s1995_s2 }
 0x677   :  { %1240 = vrot.lane.b32.xlu1 %v1205_v14, %s1996_s6 }
 0x6db   :  { %v1223_v16 = vpop.permute.xlu0 %1222  ;;  %v1237_v17 = vpop.permute.xlu1 %1236 }
 0x6dc   :  { %v1248_v24 = vsel %vm343_vm6, %v1202_v7, %v1223_v16 }
 0x6df   :  { %v1235_v19 = vpop.permute.xlu0 %1234  ;;  %v1221_v20 = vpop.permute.xlu1 %1220 }
 0x6e0   :  { %v1250_v21 = vsel %vm803_vm8, %v1246_v18, %v1235_v19  ;;  %v1247_v22 = vsel %vm343_vm6, 0.0, %v1221_v20  ;;  %v1455_v18 = vld [vmem:[%s2625_s17 + $0x18] sm:$0xff] }
 0x6e1   :  { %v1251_v23 = vsel %vm803_vm8, %v1247_v22, %v1237_v17  ;;  %1907 = vmatprep.mubr.msk.f32.mxu0 %vm821_vm9, %v1250_v21 }
 0x6e2   :  { %1908 = vmatmul.mubr.msk.f32.vlgmr.msra.gmra.mxu0 %vm821_vm9, %v1251_v23  ;;  %v1454_v23 = vld [vmem:[%s2625_s17 + $0x10] sm:$0xff] }
 0x6e5   :  { %v1239_v25 = vpop.permute.xlu0 %1238  ;;  %v1225_v26 = vpop.permute.xlu1 %1224 }
 0x6e6   :  { %v1252_v28 = vsel %vm803_vm8, %v1248_v24, %v1239_v25  ;;  %v1249_v29 = vsel %vm343_vm6, %v1203_v4, %v1225_v26  ;;  %v1469_v24 = vld [vmem:[%s2625_s17 + $0x88] sm:$0xff]  ;;  %v1468_v26 = vld [vmem:[%s2625_s17 + $0x80] sm:$0xff] }
 0x6e7   :  { %1910 = vmatprep.mubr.msk.f32.mxu0 %vm821_vm9, %v1252_v28  ;;  %v1453_v25 = vld [vmem:[%s2625_s17 + $0x8] sm:$0xff] }
 0x6e9   :  { %v1241_v30 = vpop.permute.xlu1 %1240 }
 0x6ea   :  { %v1253_v31 = vsel %vm803_vm8, %v1249_v29, %v1241_v30 }
 0x6eb   :  { %1911 = vmatmul.mubr.msk.f32.gmra.mxu0 %vm821_vm9, %v1253_v31  ;;  %v1452_v31 = vld [vmem:[%s2625_s17] sm:$0xff] }
 0x6ec   :  { %1917 = vmatprep.mubr.msk.f32.mxu0 %vm2003_vm14, %v1997_v5 }
 0x7a2   :  { %v1909_v51 = vpop.f32.mrf.mxu0 }
 0x7a3   :  { %v1351_v52 = vadd.f32 %v1909_v51, %v1703_v50 }
 0x7a4   :  { %v1345_v53 = vpop.f32.mrf.mxu0 }
 0x7a5   :  { %v1346_v54 = vadd.f32 %v1703_v50, %v1345_v53  ;;  %v1365_v55 = vmax.f32 %v1351_v52, 0.0 }
 0x7a7   :  { %v1364_v58 = vmax.f32 %v1346_v54, 0.0  ;;  %v1369_v61 = vadd.f32 %v1365_v55, %v2389_v27  ;;  %v1473_v27 = vld [vmem:[%s2625_s17 + $0xa8] sm:$0xff] }
 0x7a8   :  { %1791 = vmatprep.subr.mxu1 %v1473_v27 }
 0x7a9   :  { %v1368_v2 = vadd.f32 %v1364_v58, %v2395_v34  ;;  %v1373_v6 = vmax.f32 %v1369_v61, 0.0  ;;  %1792 = vmatpush3.msra.mxu1 %v1457_v10  ;;  %v1472_v34 = vld [vmem:[%s2625_s17 + $0xa0] sm:$0xff] }
 0x7aa   :  { %1793 = vmatprep.subr.mxu1 %v1472_v34 }
 0x7ab   :  { %v1912_v59 = vpop.f32.mrf.mxu0  ;;  %v1372_v12 = vmax.f32 %v1368_v2, 0.0  ;;  %1794 = vmatpush3.msra.mxu1 %v1456_v11  ;;  %v1393_v16 = vrot.slane %v1373_v6, 2  ;;  %v1397_v33 = vrot.slane %v1373_v6, 4  ;;  %v1401_v43 = vrot.slane %v1373_v6, 6 }
 0x7ac   :  { %v1361_v62 = vadd.f32 %v1912_v59, %v1703_v50 }
 0x7ad   :  { %v1355_v63 = vpop.f32.mrf.mxu0  ;;  %v1381_v20 = vrot.slane %v1372_v12, 4  ;;  %v1377_v29 = vrot.slane %v1372_v12, 2  ;;  %v1385_v37 = vrot.slane %v1372_v12, 6 }
 0x7ae   :  { %v1367_v3 = vmax.f32 %v1361_v62, 0.0  ;;  %v1356_v4 = vadd.f32 %v1703_v50, %v1355_v63 }
 0x7b0   :  { %v1371_v7 = vadd.f32 %v1367_v3, %v1031_v42  ;;  %v1366_v9 = vmax.f32 %v1356_v4, 0.0  ;;  %v1471_v42 = vld [vmem:[%s2625_s17 + $0x98] sm:$0xff] }
 0x7b1   :  { %1795 = vmatprep.subr.mxu1 %v1471_v42  ;;  %v1563_v42 = vld [vmem:[%s2627_s19 + $0x8] sm:$0xff] }
 0x7b2   :  { %v1375_v13 = vmax.f32 %v1371_v7, 0.0  ;;  %v1370_v40 = vadd.f32 %v1366_v9, %v2403_v41  ;;  %1796 = vmatpush3.msra.mxu1 %v1455_v18  ;;  %v1470_v41 = vld [vmem:[%s2625_s17 + $0x90] sm:$0xff]  ;;  %s2002_s17 = smov 112   ;;  %1914 = vmatpush3.msra.mxu0 %v1563_v42 }
 0x7b3   :  { %1797 = vmatprep.subr.mxu1 %v1470_v41  ;;  %1915 = vmatprep.subr.mxu0 %v1997_v5 }
 0x7b4   :  { %v1374_v14 = vmax.f32 %v1370_v40, 0.0  ;;  %v1932_v15 = vpack.i.bf16 %v1373_v6, %v1375_v13  ;;  %v1422_v17 = vrot.slane %v1375_v13, 2  ;;  %1798 = vmatpush3.msra.mxu1 %v1454_v23  ;;  %v1426_v30 = vrot.slane %v1375_v13, 4 }
 0x7b5   :  { %1799 = vmatprep.subr.mxu1 %v1469_v24  ;;  %v1430_v39 = vrot.slane %v1375_v13, 6 }
 0x7b6   :  { %1933 = vrot.lane.b32.xlu1 %v1932_v15, %s1998_s10  ;;  %v1937_v19 = vpack.i.bf16 %v1393_v16, %v1422_v17  ;;  %v1410_v21 = vrot.slane %v1374_v14, 4  ;;  %v1406_v22 = vrot.slane %v1374_v14, 2  ;;  %1800 = vmatpush3.msra.mxu1 %v1453_v25  ;;  %v1414_v35 = vrot.slane %v1374_v14, 6  ;;  %v1708_v16 = vld [vmem:[%s2626_s18] ss:$0 sm:$0xff]  ;;  %s2004_s18 = smov [#allocation2]  }
 0x7b7   :  { %1801 = vmatprep.subr.mxu1 %v1468_v26  ;;  %v1957_v36 = vpack.i.bf16 %v1397_v33, %v1426_v30  ;;  %v1962_v44 = vpack.i.bf16 %v1401_v43, %v1430_v39 }
 0x7b8   :  { %1938 = vrot.lane.b32.xlu0 %v1937_v19, %s1999_s23  ;;  %v1947_v28 = vpack.i.bf16 %v1381_v20, %v1410_v21  ;;  %v1942_v32 = vpack.i.bf16 %v1377_v29, %v1406_v22  ;;  %1802 = vmatpush3.msra.mxu1 %v1452_v31  ;;  %v1952_v38 = vpack.i.bf16 %v1385_v37, %v1414_v35  ;;  %v1709_v20 = vld [vmem:[%s2628_s20] ss:$0 sm:$0xff] }
 0x7ba   :  { %1948 = vrot.lane.b32.xlu1 %v1947_v28, %s1996_s6 }
 0x7bc   :  { %1943 = vrot.lane.b32.xlu0 %v1942_v32, %s1995_s2 }
 0x7be   :  { %1958 = vrot.lane.b32.xlu1 %v1957_v36, %s2000_s1 }
 0x7c0   :  { %1953 = vrot.lane.b32.xlu0 %v1952_v38, %s2001_s24 }
 0x7c4   :  { %1963 = vrot.lane.b32.xlu0 %v1962_v44, %s2002_s17 }
 0x828   :  { %v1934_v45 = vpop.permute.xlu1 %1933 }
 0x829   :  { %v1936_v59 = vunpack.i.h.bf16 %v1934_v45  ;;  %v1935_v60 = vunpack.i.l.bf16 %v1934_v45 }
 0x82a   :  { %v1939_v46 = vpop.permute.xlu0 %1938 }
 0x82b   :  { %v1941_v62 = vunpack.i.h.bf16 %v1939_v46  ;;  %v1940_v63 = vunpack.i.l.bf16 %v1939_v46 }
 0x82c   :  { %v1949_v47 = vpop.permute.xlu1 %1948 }
 0x82d   :  { %v1951_v53 = vunpack.i.h.bf16 %v1949_v47  ;;  %v1950_v54 = vunpack.i.l.bf16 %v1949_v47 }
 0x82e   :  { %v1944_v48 = vpop.permute.xlu0 %1943 }
 0x82f   :  { %v1946_v49 = vunpack.i.h.bf16 %v1944_v48  ;;  %v1945_v50 = vunpack.i.l.bf16 %v1944_v48 }
 0x830   :  { %v1959_v56 = vpop.permute.xlu1 %1958 }
 0x831   :  { %v1434_v51 = vsel %vm343_vm6, %v1372_v12, %v1946_v49  ;;  %v1445_v52 = vsel %vm343_vm6, %v1374_v14, %v1945_v50  ;;  %v1961_v2 = vunpack.i.h.bf16 %v1959_v56  ;;  %v1960_v3 = vunpack.i.l.bf16 %v1959_v56  ;;  %v1562_v14 = vld [vmem:[%s2627_s19] sm:$0xff]  ;;  %s1658_s19 = sshll.u32 %s2004_s18, 4  ;;  %s1659_s19 = int_to_ptr.vmem [resolvable:$true] %s1658_s19 }
 0x832   :  { %v1954_v55 = vpop.permute.xlu0 %1953  ;;  %v1435_v8 = vsel %vm803_vm8, %v1434_v51, %v1951_v53  ;;  %v1446_v61 = vsel %vm803_vm8, %v1445_v52, %v1950_v54  ;;  %1916 = vmatpush3.msra.mxu0 %v1562_v14  ;;  %s1971_s28 = scalar_lea.vmem %s1659_s19, 32  ;;  %p1976_p1 = scmp.lt.s32.totalorder %s1659_s19, %s1659_s19 }
 0x833   :  { %v1956_v57 = vunpack.i.h.bf16 %v1954_v55  ;;  %v1955_v58 = vunpack.i.l.bf16 %v1954_v55  ;;  %p1972_p0 = scmp.ne.s32.totalorder %s1659_s19, %s1971_s28  ;;  %p1977_p2 = scmp.lt.s32.totalorder %s1971_s28, %s1971_s28 }
 0x835   :  { %v1436_v0 = vsel %vm821_vm9, %v1435_v8, %v1956_v57  ;;  %v1447_v1 = vsel %vm821_vm9, %v1446_v61, %v1955_v58  ;;  %p1978_p3 = por %p1977_p2, %p1976_p1 }
 0x836   :  { %v1438_v4 = vsel %vm1437_vm10, %v1436_v0, %v1936_v59  ;;  %v1964_v27 = vpop.permute.xlu0 %1963  ;;  %v1448_v6 = vsel %vm1437_vm10, %v1447_v1, %v1935_v60 }
 0x837   :  { %v1966_v7 = vunpack.i.h.bf16 %v1964_v27  ;;  %v1965_v9 = vunpack.i.l.bf16 %v1964_v27  ;;  %v1449_v10 = vsel %vm1439_vm11, %v1448_v6, %v1940_v63  ;;  %v1440_v34 = vsel %vm1439_vm11, %v1438_v4, %v1941_v62  ;;  %p1979_p4 = pnand %p1978_p3, %p1972_p0 }
 0x838   :  { %v1450_v11 = vsel %vm1441_vm12, %v1449_v10, %v1960_v3  ;;  %v1442_v12 = vsel %vm1441_vm12, %v1440_v34, %v1961_v2 }
 0x839   :  { %v1451_v13 = vsel %vm1443_vm13, %v1450_v11, %v1965_v9  ;;  %v1444_v40 = vsel %vm1443_vm13, %v1442_v12, %v1966_v7 }
 0x83a   :  { %1555 = vmatprep.mubr.f32.mxu1 %v1451_v13 }
 0x83b   :  { %1556 = vmatmul.mubr.f32.vlgmr.msra.gmra.mxu1 %v1444_v40 }
 0x8fb   :  { %v1803_v15 = vpop.f32.mrf.mxu1 }
 0x8fd   :  { %v1804_v17 = vpop.f32.mrf.mxu1 }
 0x8fe   :  { %v1805_v18 = vadd.f32 %v1804_v17, %v1803_v15 }
 0x900   :  { %v1558_v41 = vadd.f32 %v1805_v18, %v1708_v16 }
 0x902   :  { %v1561_v19 = vmax.f32 %v1558_v41, 0.0 }
 0x904   :  { %1918 = vmatmul.mubr.msk.f32.vlgmr.msra.gmra.mxu0 %vm343_vm6, %v1561_v19 }
 0x9c4   :  { %v1640_v21 = vpop.f32.mrf.mxu0 }
 0x9c5   :  { %v1641_v22 = vadd.f32 %v1709_v20, %v1640_v21 }
 0x9c6   :  { %v1919_v23 = vpop.f32.mrf.mxu0 }
 0x9c7   :  { %v1644_v24 = vsub.f32 0.0, %v1641_v22 }
 0x9c9   :  { %v1645_v5 = vmul.f32 1.442695, %v1644_v24 }
 0x9cb   :  { %1967 = vpow2.f32 %v1645_v5 }
 0x9d8   :  { %v1968_v25 = vpop.eup %1967 }
 0x9d9   :  { %v1647_v26 = vadd.f32 1.0, %v1968_v25 }
 0x9db   :  { %1969 = vrcp.f32 %v1647_v26 }
 0x9e8   :  { %v1970_v28 = vpop.eup %1969 }
 0x9e9   :  { %1651 = vst.msk [vmem:[#allocation2] sm:$0x3] %vm1650_vm15, %v1970_v28 }
 0x9ea   :  { %1982 = shalt.err (!%p1979_p4)
}
 0x9eb   :  { %1661 = dma.vmem_to_hbm [thread:$0]  %s1659_s19, 32, %s2629_s21, [#allocation3]  }
 0x9ec   :  { %1991 = dma.done.wait [#allocation3], 32  }
 0x9ed   :  { %1992 = vsyncadd [#allocation3], 4294967264 }
 0x9ee   :  { %1665 = vsyncpa [#allocation3], 1 }

</bundles_post_ra>
